<compile_context>
chip_gen: v7x
topology: tpu7x:2x2x1
jax: 0.10.0
libtpu: 0.0.40
codegen_flags: <defaults>
</compile_context>

<pallas_src>
import jax
import jax.numpy as jnp
import numpy as np
from jax.experimental import pallas as pl
from jax.experimental.pallas import tpu as pltpu

# ------------------------- small, module-consistent dims ----------------------
B = 2            # real batch
BP = 8           # padded batch (f32 sublane count)
S = 8            # sequence length
D = 32           # "bert" hidden size (stand-in for bert.config.hidden_size)
H = 32           # lstm_hidden_size (per direction)
C = 2            # num_classes
VOCAB = 100
G = 8 * H        # both directions' gates: [i_f i_b | f_f f_b | o_f o_b | g_f g_b]
OUT_LANES = 128  # single lane-dense output width

# ------------------- static row offsets inside the weight slab ----------------
R_WIH0 = 0                   # (2D, G)  layer-0 input weights (fwd rows then bwd rows)
R_WHH0 = R_WIH0 + 2 * D      # (2H, G)  layer-0 block-diagonal recurrent weights
R_B0 = R_WHH0 + 2 * H        # (1,  G)  layer-0 combined bias
R_WA1 = R_B0 + 8             # (2H, G)  layer-1 input weights applied to H_all
R_WB1 = R_WA1 + 2 * H        # (2H, G)  layer-1 input weights applied to H_rev
R_WHH1 = R_WB1 + 2 * H       # (2H, G)  layer-1 recurrent weights
R_B1 = R_WHH1 + 2 * H        # (1,  G)  layer-1 combined bias
R_AA = R_B1 + 8              # (2H, 2H) attention W1.T rows applied to H2_all
R_AB = R_AA + 2 * H          # (2H, 2H) attention W1.T rows applied to H2_rev
R_AB1 = R_AB + 2 * H         # (1,  2H) attention bias b1
R_AW2 = R_AB1 + 8            # (1,  2H) attention second linear weight
R_C1A = R_AW2 + 8            # (2H, H)  classifier W1.T rows applied to att_all
R_C1B = R_C1A + 2 * H        # (2H, H)  classifier W1.T rows applied to att_rev
R_CB1 = R_C1B + 2 * H        # (1,  H)  classifier bias 1
R_WC2 = R_CB1 + 8            # (H,  C)  classifier W2.T
R_CB2 = R_WC2 + H            # (1,  C)  classifier bias 2
W_ROWS = R_CB2 + 8           # 656 rows total


# ------------------------------- Pallas kernel --------------------------------
def _lstm_scan(pre, w_hh):
    """Fused fwd+bwd LSTM recurrence, statically unrolled over S steps.

    pre  : (S*BP, G) hoisted input projection (+ bias); row block t holds the fwd input
           at time t and the bwd input at time S-1-t (bwd input pre-reversed).
    w_hh : (2H, G) block-diagonal recurrent weights (fwd rows feed fwd columns only).
    Returns a list of the S carried hidden states, each (BP, 2H) = [h_fwd(t) | h_bwd(S-1-t)].
    """
    h = jnp.zeros((BP, 2 * H), jnp.float32)
    c = jnp.zeros((BP, 2 * H), jnp.float32)
    hs = []
    for t in range(S):                                  # static unroll (S is tiny, fixed)
        g = pre[t * BP:(t + 1) * BP, :] + jnp.dot(h, w_hh,
                                                  preferred_element_type=jnp.float32)
        sg = jax.nn.sigmoid(g[:, 0:6 * H])              # one wide sigmoid: [i | f | o]
        gg = jnp.tanh(g[:, 6 * H:8 * H])                # one tanh: [g]
        c = sg[:, 2 * H:4 * H] * c + sg[:, 0:2 * H] * gg
        h = sg[:, 4 * H:6 * H] * jnp.tanh(c)
        hs.append(h)
    return hs


def hybrid_kernel(x_ref, w_ref, out_ref):
    # ---- layer 0: hoisted input projection + fused bidirectional recurrence ----
    pre0 = (jnp.dot(x_ref[...], w_ref[R_WIH0:R_WIH0 + 2 * D, :],
                    preferred_element_type=jnp.float32)
            + w_ref[R_B0:R_B0 + 1, :])                            # (S*BP, G)
    hs0 = _lstm_scan(pre0, w_ref[R_WHH0:R_WHH0 + 2 * H, :])

    # Carried step states stacked in time order / reversed time order (sublane concat only).
    h1_all = jnp.concatenate(hs0, axis=0)                         # block t = [hf(t)|hb(S-1-t)]
    h1_rev = jnp.concatenate(hs0[::-1], axis=0)                   # block t = [hf(S-1-t)|hb(t)]

    # ---- layer 1: input projection straight off the carried states (no relayout) ----
    pre1 = (jnp.dot(h1_all, w_ref[R_WA1:R_WA1 + 2 * H, :],
                    preferred_element_type=jnp.float32)
            + jnp.dot(h1_rev, w_ref[R_WB1:R_WB1 + 2 * H, :],
                      preferred_element_type=jnp.float32)
            + w_ref[R_B1:R_B1 + 1, :])                            # (S*BP, G)
    hs1 = _lstm_scan(pre1, w_ref[R_WHH1:R_WHH1 + 2 * H, :])

    h2_all = jnp.concatenate(hs1, axis=0)                         # (S*BP, 2H)
    h2_rev = jnp.concatenate(hs1[::-1], axis=0)

    # ---- attention (weight rows pre-split: no lane slicing of activations) ----
    a = jnp.tanh(
        jnp.dot(h2_all, w_ref[R_AA:R_AA + 2 * H, 0:2 * H],
                preferred_element_type=jnp.float32)
        + jnp.dot(h2_rev, w_ref[R_AB:R_AB + 2 * H, 0:2 * H],
                  preferred_element_type=jnp.float32)
        + w_ref[R_AB1:R_AB1 + 1, 0:2 * H])                        # (S*BP, 2H)
    wa2 = w_ref[R_AW2:R_AW2 + 1, 0:2 * H]                         # (1, 2H)
    # attention bias b2 is omitted: softmax over the sequence is shift-invariant.

    a3 = a.reshape(S, BP, 2 * H)                                  # free 8-row-aligned reshape
    s3 = jnp.sum(a3 * wa2, axis=-1, keepdims=True)                # (S, BP, 1) scores
    m = jnp.max(s3, axis=0, keepdims=True)
    e = jnp.exp(s3 - m)
    w3 = e * pl.reciprocal(jnp.sum(e, axis=0, keepdims=True), approx=True)  # (S, BP, 1)

    att_all = jnp.sum(w3 * h2_all.reshape(S, BP, 2 * H), axis=0)  # (BP, 2H); cols 0:H valid
    att_rev = jnp.sum(w3 * h2_rev.reshape(S, BP, 2 * H), axis=0)  # (BP, 2H); cols H:2H valid

    # ---- classifier (Dropout is identity at inference; split rows pick valid columns) ----
    hcls = jnp.maximum(
        jnp.dot(att_all, w_ref[R_C1A:R_C1A + 2 * H, 0:H],
                preferred_element_type=jnp.float32)
        + jnp.dot(att_rev, w_ref[R_C1B:R_C1B + 2 * H, 0:H],
                  preferred_element_type=jnp.float32)
        + w_ref[R_CB1:R_CB1 + 1, 0:H], 0.0)                       # (BP, H)
    logits = (jnp.dot(hcls, w_ref[R_WC2:R_WC2 + H, 0:C],
                      preferred_element_type=jnp.float32)
              + w_ref[R_CB2:R_CB2 + 1, 0:C])                      # (BP, C)

    # ---- single lane-dense output store ----
    # lane 0            : attention weight column, row t*BP+b = w[b, t]
    # lanes 8 : 8+C     : logits in rows 0:BP
    w_col = w3.reshape(S * BP, 1)
    logits_pad = jnp.concatenate(
        [logits, jnp.zeros((S * BP - BP, C), jnp.float32)], axis=0)
    out_ref[...] = jnp.concatenate(
        [w_col,
         jnp.zeros((S * BP, 7), jnp.float32),
         logits_pad,
         jnp.zeros((S * BP, OUT_LANES - 8 - C), jnp.float32)], axis=-1)


# ------------------------------ weight packing ---------------------------------
def _pack_gate_cols(wf, wb):
    """(.., 4H) fwd / bwd weights in PyTorch gate order (i,f,g,o) -> (.., 8H) columns
    ordered [i_f i_b | f_f f_b | o_f o_b | g_f g_b] (sigmoid gates first, tanh gate last)."""
    cols = []
    for k in (0, 1, 3, 2):
        cols.append(wf[..., k * H:(k + 1) * H])
        cols.append(wb[..., k * H:(k + 1) * H])
    return jnp.concatenate(cols, axis=-1)


def pack_weights(params):
    """Pack ALL module parameters into one (W_ROWS, G) f32 slab (done once per model)."""
    lstm, att, cls = params["lstm"], params["att"], params["cls"]

    def dir_params(p):
        return p["w_ih"].T, p["w_hh"].T, (p["b_ih"] + p["b_hh"])[None, :]

    wif0, whf0, bf0 = dir_params(lstm["l0f"])          # (D,4H), (H,4H), (1,4H)
    wib0, whb0, bb0 = dir_params(lstm["l0b"])
    wif1, whf1, bf1 = dir_params(lstm["l1f"])          # (2H,4H), (H,4H), (1,4H)
    wib1, whb1, bb1 = dir_params(lstm["l1b"])

    zD = jnp.zeros((D, 4 * H), jnp.float32)
    zH = jnp.zeros((H, 4 * H), jnp.float32)

    w_ih0 = jnp.concatenate([_pack_gate_cols(wif0, zD),
                             _pack_gate_cols(zD, wib0)], axis=0)          # (2D, G)
    w_hh0 = jnp.concatenate([_pack_gate_cols(whf0, zH),
                             _pack_gate_cols(zH, whb0)], axis=0)          # (2H, G)
    b0 = _pack_gate_cols(bf0, bb0)                                        # (1, G)

    # Layer-1 input weights, row-split so pre1 = H_all @ W_A + H_rev @ W_B works
    # directly on the carried [h_fwd(t) | h_bwd(S-1-t)] step states.
    w_a1 = jnp.concatenate([_pack_gate_cols(wif1[0:H], zH),               # hf(t)     -> fwd cols
                            _pack_gate_cols(zH, wib1[H:2 * H])], axis=0)  # hb(S-1-t) -> bwd cols
    w_b1 = jnp.concatenate([_pack_gate_cols(zH, wib1[0:H]),               # hf(S-1-t) -> bwd cols
                            _pack_gate_cols(wif1[H:2 * H], zH)], axis=0)  # hb(t)     -> fwd cols
    w_hh1 = jnp.concatenate([_pack_gate_cols(whf1, zH),
                             _pack_gate_cols(zH, whb1)], axis=0)
    b1 = _pack_gate_cols(bf1, bb1)

    # Attention: a = tanh(H2_all @ Wa_A + H2_rev @ Wa_B + b1); score = a . w2.
    w1t = att["w1"].T                                                     # (2H, 2H)
    zh2 = jnp.zeros((H, 2 * H), jnp.float32)
    wa_a = jnp.concatenate([w1t[0:H], zh2], axis=0)                       # picks hf2(t)
    wa_b = jnp.concatenate([zh2, w1t[H:2 * H]], axis=0)                   # picks hb2(t)
    ba1 = att["b1"][None, :]
    wa2 = att["w2"]

    # Classifier: h = relu(att_all @ Wc1_A + att_rev @ Wc1_B + b1); logits = h @ Wc2 + b2.
    c1t = cls["w1"].T                                                     # (2H, H)
    zh1 = jnp.zeros((H, H), jnp.float32)
    wc1_a = jnp.concatenate([c1t[0:H], zh1], axis=0)
    wc1_b = jnp.concatenate([zh1, c1t[H:2 * H]], axis=0)
    bc1 = cls["b1"][None, :]
    wc2 = cls["w2"].T                                                     # (H, C)
    bc2 = cls["b2"][None, :]

    def block(x, rows):
        r, c = x.shape
        return jnp.pad(x.astype(jnp.float32), ((0, rows - r), (0, G - c)))

    slab = jnp.concatenate([
        block(w_ih0, 2 * D), block(w_hh0, 2 * H), block(b0, 8),
        block(w_a1, 2 * H), block(w_b1, 2 * H), block(w_hh1, 2 * H), block(b1, 8),
        block(wa_a, 2 * H), block(wa_b, 2 * H), block(ba1, 8), block(wa2, 8),
        block(wc1_a, 2 * H), block(wc1_b, 2 * H), block(bc1, 8),
        block(wc2, H), block(bc2, 8),
    ], axis=0)
    assert slab.shape == (W_ROWS, G)
    return slab


# -------------------------------- wrapper --------------------------------------
_VMEM = pl.BlockSpec(memory_space=pltpu.MemorySpace.VMEM)


@jax.jit
def hybrid_forward(bert_embeddings, w_slab):
    """bert_embeddings: (B, S, D) f32 (batch_first, like the PyTorch module).
    w_slab: pre-packed (W_ROWS, G) weight slab (pack_weights, computed once)."""
    emb = jnp.transpose(bert_embeddings.astype(jnp.float32), (1, 0, 2))   # (S, B, D)
    emb = jnp.pad(emb, ((0, 0), (0, BP - B), (0, 0)))                     # pad batch to 8
    x0 = jnp.concatenate([emb.reshape(S * BP, D),
                          emb[::-1].reshape(S * BP, D)], axis=-1)          # (S*BP, 2D)

    # TODO(synk): for real batched inference on v7x, add a leading grid axis over batch
    # tiles with dimension_semantics=("parallel",) so both TensorCores are used.
    out = pl.pallas_call(
        hybrid_kernel,
        out_shape=jax.ShapeDtypeStruct((S * BP, OUT_LANES), jnp.float32),
        in_specs=[_VMEM, _VMEM],
        out_specs=_VMEM,
    )(x0, w_slab)

    logits = out[0:B, 8:8 + C]                                             # (B, C)
    attnw = out[:, 0].reshape(S, BP)[:, 0:B].T[:, :, None]                 # (B, S, 1)
    return {"logits": logits, "attention_weights": attnw}


def predict(bert_embeddings, w_slab):
    return jax.nn.softmax(hybrid_forward(bert_embeddings, w_slab)["logits"], axis=1)


# --------------------------- deterministic parameters ---------------------------
def init_params(key):
    keys = jax.random.split(key, 32)
    it = iter(keys)

    def uni(shape, bound):
        return jax.random.uniform(next(it), shape, jnp.float32, -bound, bound)

    kH = 1.0 / np.sqrt(H)
    k2H = 1.0 / np.sqrt(2 * H)

    lstm = {}
    for name, din in (("l0f", D), ("l0b", D), ("l1f", 2 * H), ("l1b", 2 * H)):
        lstm[name] = dict(
            w_ih=uni((4 * H, din), kH),
            w_hh=uni((4 * H, H), kH),
            b_ih=uni((4 * H,), kH),
            b_hh=uni((4 * H,), kH),
        )
    att = dict(w1=uni((2 * H, 2 * H), k2H), b1=uni((2 * H,), k2H),
               w2=uni((1, 2 * H), k2H), b2=uni((1,), k2H))
    cls = dict(w1=uni((H, 2 * H), k2H), b1=uni((H,), k2H),
               w2=uni((C, H), kH), b2=uni((C,), kH))
    return dict(lstm=lstm, att=att, cls=cls)


# ------------------------------- pure-JAX reference -----------------------------
def reference_forward(bert_embeddings, params):
    x = bert_embeddings.astype(jnp.float32)

    def lstm_dir(xs_bsd, p, reverse):
        xs = jnp.transpose(xs_bsd, (1, 0, 2))
        if reverse:
            xs = xs[::-1]

        def step(carry, x_t):
            h, c = carry
            g = x_t @ p["w_ih"].T + h @ p["w_hh"].T + p["b_ih"] + p["b_hh"]
            i = jax.nn.sigmoid(g[:, 0:H])
            f = jax.nn.sigmoid(g[:, H:2 * H])
            gg = jnp.tanh(g[:, 2 * H:3 * H])
            o = jax.nn.sigmoid(g[:, 3 * H:4 * H])
            c = f * c + i * gg
            h = o * jnp.tanh(c)
            return (h, c), h

        init = (jnp.zeros((B, H), jnp.float32), jnp.zeros((B, H), jnp.float32))
        _, hs = jax.lax.scan(step, init, xs)
        if reverse:
            hs = hs[::-1]
        return jnp.transpose(hs, (1, 0, 2))

    l1 = jnp.concatenate([lstm_dir(x, params["lstm"]["l0f"], False),
                          lstm_dir(x, params["lstm"]["l0b"], True)], axis=-1)
    l2 = jnp.concatenate([lstm_dir(l1, params["lstm"]["l1f"], False),
                          lstm_dir(l1, params["lstm"]["l1b"], True)], axis=-1)

    att = params["att"]
    a = jnp.tanh(l2 @ att["w1"].T + att["b1"])
    scores = a @ att["w2"].T + att["b2"]
    w = jax.nn.softmax(scores, axis=1)
    attended = jnp.sum(w * l2, axis=1)

    cls = params["cls"]
    h1 = jnp.maximum(attended @ cls["w1"].T + cls["b1"], 0.0)
    logits = h1 @ cls["w2"].T + cls["b2"]
    return logits, w


# ------------------------------------ main ---------------------------------------
if __name__ == "__main__":
    root = jax.random.PRNGKey(0)
    k_ids, k_emb, k_par = jax.random.split(root, 3)

    input_ids = jax.random.randint(k_ids, (B, S), 0, VOCAB)
    attention_mask = jnp.ones((B, S), dtype=jnp.int32)

    # TODO(synk): the pretrained BERT encoder has no clean Pallas equivalent here; its
    # last_hidden_state is replaced by a deterministic embedding-table lookup, so
    # attention_mask (which only feeds the BERT encoder internally) goes unused downstream.
    emb_table = 0.02 * jax.random.normal(k_emb, (VOCAB, D), jnp.float32)
    bert_embeddings = emb_table[input_ids]                # (B, S, D)

    params = init_params(k_par)

    # Weight packing hoisted out of the per-call path: done once, reused every call.
    w_slab = jax.block_until_ready(pack_weights(params))

    out = jax.block_until_ready(hybrid_forward(bert_embeddings, w_slab))

    ref_logits, ref_w = reference_forward(bert_embeddings, params)
    np.testing.assert_allclose(np.asarray(out["logits"]), np.asarray(ref_logits),
                               rtol=2e-3, atol=2e-3)
    np.testing.assert_allclose(np.asarray(out["attention_weights"]), np.asarray(ref_w),
                               rtol=2e-3, atol=2e-3)
    assert out["logits"].shape == (B, C)
    assert out["attention_weights"].shape == (B, S, 1)

    _ = jax.block_until_ready(predict(bert_embeddings, w_slab))
    print("KERNEL_OK")
</pallas_src>

<mosaic_0001>
module attributes {stable_mosaic.version = 11 : i64} {
  func.func @hybrid_kernel(%arg0: memref<64x64xf32, #tpu.memory_space<vmem>>, %arg1: memref<656x256xf32, #tpu.memory_space<vmem>>, %arg2: memref<64x128xf32, #tpu.memory_space<vmem>>) attributes {dimension_semantics = [], scalar_prefetch = 0 : i64, scratch_operands = 0 : i64, tpu.core_type = #tpu.core_type<tc>} {
    %c0 = arith.constant 0 : index
    %c0_0 = arith.constant 0 : index
    %0 = vector.load %arg0[%c0, %c0_0] : memref<64x64xf32, #tpu.memory_space<vmem>>, vector<64x64xf32>
    %c0_1 = arith.constant 0 : index
    %c0_2 = arith.constant 0 : index
    %1 = vector.load %arg1[%c0_1, %c0_2] : memref<656x256xf32, #tpu.memory_space<vmem>>, vector<64x256xf32>
    %cst = arith.constant dense<0.000000e+00> : vector<64x256xf32>
    %2 = tpu.matmul %0, %1, %cst {dimension_numbers = #tpu.dot_dimension_numbers<[1], [0], [0], [1], [0, 0, 1, 1], [], []>} : vector<64x64xf32>, vector<64x256xf32>, vector<64x256xf32> -> vector<64x256xf32>
    %c128 = arith.constant 128 : index
    %c0_3 = arith.constant 0 : index
    %3 = vector.load %arg1[%c128, %c0_3] : memref<656x256xf32, #tpu.memory_space<vmem>>, vector<1x256xf32>
    %4 = vector.broadcast %3 : vector<1x256xf32> to vector<64x256xf32>
    %5 = arith.addf %2, %4 : vector<64x256xf32>
    %c64 = arith.constant 64 : index
    %c0_4 = arith.constant 0 : index
    %6 = vector.load %arg1[%c64, %c0_4] : memref<656x256xf32, #tpu.memory_space<vmem>>, vector<64x256xf32>
    %cst_5 = arith.constant 0.000000e+00 : f32
    %7 = vector.broadcast %cst_5 : f32 to vector<8x64xf32>
    %cst_6 = arith.constant 0.000000e+00 : f32
    %8 = vector.broadcast %cst_6 : f32 to vector<8x64xf32>
    %9 = vector.extract_strided_slice %5 {offsets = [0, 0], sizes = [8, 256], strides = [1, 1]} : vector<64x256xf32> to vector<8x256xf32>
    %cst_7 = arith.constant dense<0.000000e+00> : vector<8x256xf32>
    %10 = tpu.matmul %7, %6, %cst_7 {dimension_numbers = #tpu.dot_dimension_numbers<[1], [0], [0], [1], [0, 0, 1, 1], [], []>} : vector<8x64xf32>, vector<64x256xf32>, vector<8x256xf32> -> vector<8x256xf32>
    %11 = arith.addf %9, %10 : vector<8x256xf32>
    %12 = vector.extract_strided_slice %11 {offsets = [0, 0], sizes = [8, 192], strides = [1, 1]} : vector<8x256xf32> to vector<8x192xf32>
    %13 = arith.negf %12 : vector<8x192xf32>
    %14 = math.exp %13 : vector<8x192xf32>
    %cst_8 = arith.constant 1.000000e+00 : f32
    %15 = vector.broadcast %cst_8 : f32 to vector<8x192xf32>
    %16 = arith.addf %15, %14 : vector<8x192xf32>
    %17 = arith.divf %15, %16 : vector<8x192xf32>
    %18 = vector.extract_strided_slice %11 {offsets = [0, 192], sizes = [8, 64], strides = [1, 1]} : vector<8x256xf32> to vector<8x64xf32>
    %19 = math.tanh %18 : vector<8x64xf32>
    %20 = vector.extract_strided_slice %17 {offsets = [0, 64], sizes = [8, 64], strides = [1, 1]} : vector<8x192xf32> to vector<8x64xf32>
    %21 = arith.mulf %20, %8 : vector<8x64xf32>
    %22 = vector.extract_strided_slice %17 {offsets = [0, 0], sizes = [8, 64], strides = [1, 1]} : vector<8x192xf32> to vector<8x64xf32>
    %23 = arith.mulf %22, %19 : vector<8x64xf32>
    %24 = arith.addf %21, %23 : vector<8x64xf32>
    %25 = vector.extract_strided_slice %17 {offsets = [0, 128], sizes = [8, 64], strides = [1, 1]} : vector<8x192xf32> to vector<8x64xf32>
    %26 = math.tanh %24 : vector<8x64xf32>
    %27 = arith.mulf %25, %26 : vector<8x64xf32>
    %28 = vector.extract_strided_slice %5 {offsets = [8, 0], sizes = [8, 256], strides = [1, 1]} : vector<64x256xf32> to vector<8x256xf32>
    %cst_9 = arith.constant dense<0.000000e+00> : vector<8x256xf32>
    %29 = tpu.matmul %27, %6, %cst_9 {dimension_numbers = #tpu.dot_dimension_numbers<[1], [0], [0], [1], [0, 0, 1, 1], [], []>} : vector<8x64xf32>, vector<64x256xf32>, vector<8x256xf32> -> vector<8x256xf32>
    %30 = arith.addf %28, %29 : vector<8x256xf32>
    %31 = vector.extract_strided_slice %30 {offsets = [0, 0], sizes = [8, 192], strides = [1, 1]} : vector<8x256xf32> to vector<8x192xf32>
    %32 = arith.negf %31 : vector<8x192xf32>
    %33 = math.exp %32 : vector<8x192xf32>
    %cst_10 = arith.constant 1.000000e+00 : f32
    %34 = vector.broadcast %cst_10 : f32 to vector<8x192xf32>
    %35 = arith.addf %34, %33 : vector<8x192xf32>
    %36 = arith.divf %34, %35 : vector<8x192xf32>
    %37 = vector.extract_strided_slice %30 {offsets = [0, 192], sizes = [8, 64], strides = [1, 1]} : vector<8x256xf32> to vector<8x64xf32>
    %38 = math.tanh %37 : vector<8x64xf32>
    %39 = vector.extract_strided_slice %36 {offsets = [0, 64], sizes = [8, 64], strides = [1, 1]} : vector<8x192xf32> to vector<8x64xf32>
    %40 = arith.mulf %39, %24 : vector<8x64xf32>
    %41 = vector.extract_strided_slice %36 {offsets = [0, 0], sizes = [8, 64], strides = [1, 1]} : vector<8x192xf32> to vector<8x64xf32>
    %42 = arith.mulf %41, %38 : vector<8x64xf32>
    %43 = arith.addf %40, %42 : vector<8x64xf32>
    %44 = vector.extract_strided_slice %36 {offsets = [0, 128], sizes = [8, 64], strides = [1, 1]} : vector<8x192xf32> to vector<8x64xf32>
    %45 = math.tanh %43 : vector<8x64xf32>
    %46 = arith.mulf %44, %45 : vector<8x64xf32>
    %47 = vector.extract_strided_slice %5 {offsets = [16, 0], sizes = [8, 256], strides = [1, 1]} : vector<64x256xf32> to vector<8x256xf32>
    %cst_11 = arith.constant dense<0.000000e+00> : vector<8x256xf32>
    %48 = tpu.matmul %46, %6, %cst_11 {dimension_numbers = #tpu.dot_dimension_numbers<[1], [0], [0], [1], [0, 0, 1, 1], [], []>} : vector<8x64xf32>, vector<64x256xf32>, vector<8x256xf32> -> vector<8x256xf32>
    %49 = arith.addf %47, %48 : vector<8x256xf32>
    %50 = vector.extract_strided_slice %49 {offsets = [0, 0], sizes = [8, 192], strides = [1, 1]} : vector<8x256xf32> to vector<8x192xf32>
    %51 = arith.negf %50 : vector<8x192xf32>
    %52 = math.exp %51 : vector<8x192xf32>
    %cst_12 = arith.constant 1.000000e+00 : f32
    %53 = vector.broadcast %cst_12 : f32 to vector<8x192xf32>
    %54 = arith.addf %53, %52 : vector<8x192xf32>
    %55 = arith.divf %53, %54 : vector<8x192xf32>
    %56 = vector.extract_strided_slice %49 {offsets = [0, 192], sizes = [8, 64], strides = [1, 1]} : vector<8x256xf32> to vector<8x64xf32>
    %57 = math.tanh %56 : vector<8x64xf32>
    %58 = vector.extract_strided_slice %55 {offsets = [0, 64], sizes = [8, 64], strides = [1, 1]} : vector<8x192xf32> to vector<8x64xf32>
    %59 = arith.mulf %58, %43 : vector<8x64xf32>
    %60 = vector.extract_strided_slice %55 {offsets = [0, 0], sizes = [8, 64], strides = [1, 1]} : vector<8x192xf32> to vector<8x64xf32>
    %61 = arith.mulf %60, %57 : vector<8x64xf32>
    %62 = arith.addf %59, %61 : vector<8x64xf32>
    %63 = vector.extract_strided_slice %55 {offsets = [0, 128], sizes = [8, 64], strides = [1, 1]} : vector<8x192xf32> to vector<8x64xf32>
    %64 = math.tanh %62 : vector<8x64xf32>
    %65 = arith.mulf %63, %64 : vector<8x64xf32>
    %66 = vector.extract_strided_slice %5 {offsets = [24, 0], sizes = [8, 256], strides = [1, 1]} : vector<64x256xf32> to vector<8x256xf32>
    %cst_13 = arith.constant dense<0.000000e+00> : vector<8x256xf32>
    %67 = tpu.matmul %65, %6, %cst_13 {dimension_numbers = #tpu.dot_dimension_numbers<[1], [0], [0], [1], [0, 0, 1, 1], [], []>} : vector<8x64xf32>, vector<64x256xf32>, vector<8x256xf32> -> vector<8x256xf32>
    %68 = arith.addf %66, %67 : vector<8x256xf32>
    %69 = vector.extract_strided_slice %68 {offsets = [0, 0], sizes = [8, 192], strides = [1, 1]} : vector<8x256xf32> to vector<8x192xf32>
    %70 = arith.negf %69 : vector<8x192xf32>
    %71 = math.exp %70 : vector<8x192xf32>
    %cst_14 = arith.constant 1.000000e+00 : f32
    %72 = vector.broadcast %cst_14 : f32 to vector<8x192xf32>
    %73 = arith.addf %72, %71 : vector<8x192xf32>
    %74 = arith.divf %72, %73 : vector<8x192xf32>
    %75 = vector.extract_strided_slice %68 {offsets = [0, 192], sizes = [8, 64], strides = [1, 1]} : vector<8x256xf32> to vector<8x64xf32>
    %76 = math.tanh %75 : vector<8x64xf32>
    %77 = vector.extract_strided_slice %74 {offsets = [0, 64], sizes = [8, 64], strides = [1, 1]} : vector<8x192xf32> to vector<8x64xf32>
    %78 = arith.mulf %77, %62 : vector<8x64xf32>
    %79 = vector.extract_strided_slice %74 {offsets = [0, 0], sizes = [8, 64], strides = [1, 1]} : vector<8x192xf32> to vector<8x64xf32>
    %80 = arith.mulf %79, %76 : vector<8x64xf32>
    %81 = arith.addf %78, %80 : vector<8x64xf32>
    %82 = vector.extract_strided_slice %74 {offsets = [0, 128], sizes = [8, 64], strides = [1, 1]} : vector<8x192xf32> to vector<8x64xf32>
    %83 = math.tanh %81 : vector<8x64xf32>
    %84 = arith.mulf %82, %83 : vector<8x64xf32>
    %85 = vector.extract_strided_slice %5 {offsets = [32, 0], sizes = [8, 256], strides = [1, 1]} : vector<64x256xf32> to vector<8x256xf32>
    %cst_15 = arith.constant dense<0.000000e+00> : vector<8x256xf32>
    %86 = tpu.matmul %84, %6, %cst_15 {dimension_numbers = #tpu.dot_dimension_numbers<[1], [0], [0], [1], [0, 0, 1, 1], [], []>} : vector<8x64xf32>, vector<64x256xf32>, vector<8x256xf32> -> vector<8x256xf32>
    %87 = arith.addf %85, %86 : vector<8x256xf32>
    %88 = vector.extract_strided_slice %87 {offsets = [0, 0], sizes = [8, 192], strides = [1, 1]} : vector<8x256xf32> to vector<8x192xf32>
    %89 = arith.negf %88 : vector<8x192xf32>
    %90 = math.exp %89 : vector<8x192xf32>
    %cst_16 = arith.constant 1.000000e+00 : f32
    %91 = vector.broadcast %cst_16 : f32 to vector<8x192xf32>
    %92 = arith.addf %91, %90 : vector<8x192xf32>
    %93 = arith.divf %91, %92 : vector<8x192xf32>
    %94 = vector.extract_strided_slice %87 {offsets = [0, 192], sizes = [8, 64], strides = [1, 1]} : vector<8x256xf32> to vector<8x64xf32>
    %95 = math.tanh %94 : vector<8x64xf32>
    %96 = vector.extract_strided_slice %93 {offsets = [0, 64], sizes = [8, 64], strides = [1, 1]} : vector<8x192xf32> to vector<8x64xf32>
    %97 = arith.mulf %96, %81 : vector<8x64xf32>
    %98 = vector.extract_strided_slice %93 {offsets = [0, 0], sizes = [8, 64], strides = [1, 1]} : vector<8x192xf32> to vector<8x64xf32>
    %99 = arith.mulf %98, %95 : vector<8x64xf32>
    %100 = arith.addf %97, %99 : vector<8x64xf32>
    %101 = vector.extract_strided_slice %93 {offsets = [0, 128], sizes = [8, 64], strides = [1, 1]} : vector<8x192xf32> to vector<8x64xf32>
    %102 = math.tanh %100 : vector<8x64xf32>
    %103 = arith.mulf %101, %102 : vector<8x64xf32>
    %104 = vector.extract_strided_slice %5 {offsets = [40, 0], sizes = [8, 256], strides = [1, 1]} : vector<64x256xf32> to vector<8x256xf32>
    %cst_17 = arith.constant dense<0.000000e+00> : vector<8x256xf32>
    %105 = tpu.matmul %103, %6, %cst_17 {dimension_numbers = #tpu.dot_dimension_numbers<[1], [0], [0], [1], [0, 0, 1, 1], [], []>} : vector<8x64xf32>, vector<64x256xf32>, vector<8x256xf32> -> vector<8x256xf32>
    %106 = arith.addf %104, %105 : vector<8x256xf32>
    %107 = vector.extract_strided_slice %106 {offsets = [0, 0], sizes = [8, 192], strides = [1, 1]} : vector<8x256xf32> to vector<8x192xf32>
    %108 = arith.negf %107 : vector<8x192xf32>
    %109 = math.exp %108 : vector<8x192xf32>
    %cst_18 = arith.constant 1.000000e+00 : f32
    %110 = vector.broadcast %cst_18 : f32 to vector<8x192xf32>
    %111 = arith.addf %110, %109 : vector<8x192xf32>
    %112 = arith.divf %110, %111 : vector<8x192xf32>
    %113 = vector.extract_strided_slice %106 {offsets = [0, 192], sizes = [8, 64], strides = [1, 1]} : vector<8x256xf32> to vector<8x64xf32>
    %114 = math.tanh %113 : vector<8x64xf32>
    %115 = vector.extract_strided_slice %112 {offsets = [0, 64], sizes = [8, 64], strides = [1, 1]} : vector<8x192xf32> to vector<8x64xf32>
    %116 = arith.mulf %115, %100 : vector<8x64xf32>
    %117 = vector.extract_strided_slice %112 {offsets = [0, 0], sizes = [8, 64], strides = [1, 1]} : vector<8x192xf32> to vector<8x64xf32>
    %118 = arith.mulf %117, %114 : vector<8x64xf32>
    %119 = arith.addf %116, %118 : vector<8x64xf32>
    %120 = vector.extract_strided_slice %112 {offsets = [0, 128], sizes = [8, 64], strides = [1, 1]} : vector<8x192xf32> to vector<8x64xf32>
    %121 = math.tanh %119 : vector<8x64xf32>
    %122 = arith.mulf %120, %121 : vector<8x64xf32>
    %123 = vector.extract_strided_slice %5 {offsets = [48, 0], sizes = [8, 256], strides = [1, 1]} : vector<64x256xf32> to vector<8x256xf32>
    %cst_19 = arith.constant dense<0.000000e+00> : vector<8x256xf32>
    %124 = tpu.matmul %122, %6, %cst_19 {dimension_numbers = #tpu.dot_dimension_numbers<[1], [0], [0], [1], [0, 0, 1, 1], [], []>} : vector<8x64xf32>, vector<64x256xf32>, vector<8x256xf32> -> vector<8x256xf32>
    %125 = arith.addf %123, %124 : vector<8x256xf32>
    %126 = vector.extract_strided_slice %125 {offsets = [0, 0], sizes = [8, 192], strides = [1, 1]} : vector<8x256xf32> to vector<8x192xf32>
    %127 = arith.negf %126 : vector<8x192xf32>
    %128 = math.exp %127 : vector<8x192xf32>
    %cst_20 = arith.constant 1.000000e+00 : f32
    %129 = vector.broadcast %cst_20 : f32 to vector<8x192xf32>
    %130 = arith.addf %129, %128 : vector<8x192xf32>
    %131 = arith.divf %129, %130 : vector<8x192xf32>
    %132 = vector.extract_strided_slice %125 {offsets = [0, 192], sizes = [8, 64], strides = [1, 1]} : vector<8x256xf32> to vector<8x64xf32>
    %133 = math.tanh %132 : vector<8x64xf32>
    %134 = vector.extract_strided_slice %131 {offsets = [0, 64], sizes = [8, 64], strides = [1, 1]} : vector<8x192xf32> to vector<8x64xf32>
    %135 = arith.mulf %134, %119 : vector<8x64xf32>
    %136 = vector.extract_strided_slice %131 {offsets = [0, 0], sizes = [8, 64], strides = [1, 1]} : vector<8x192xf32> to vector<8x64xf32>
    %137 = arith.mulf %136, %133 : vector<8x64xf32>
    %138 = arith.addf %135, %137 : vector<8x64xf32>
    %139 = vector.extract_strided_slice %131 {offsets = [0, 128], sizes = [8, 64], strides = [1, 1]} : vector<8x192xf32> to vector<8x64xf32>
    %140 = math.tanh %138 : vector<8x64xf32>
    %141 = arith.mulf %139, %140 : vector<8x64xf32>
    %142 = vector.extract_strided_slice %5 {offsets = [56, 0], sizes = [8, 256], strides = [1, 1]} : vector<64x256xf32> to vector<8x256xf32>
    %cst_21 = arith.constant dense<0.000000e+00> : vector<8x256xf32>
    %143 = tpu.matmul %141, %6, %cst_21 {dimension_numbers = #tpu.dot_dimension_numbers<[1], [0], [0], [1], [0, 0, 1, 1], [], []>} : vector<8x64xf32>, vector<64x256xf32>, vector<8x256xf32> -> vector<8x256xf32>
    %144 = arith.addf %142, %143 : vector<8x256xf32>
    %145 = vector.extract_strided_slice %144 {offsets = [0, 0], sizes = [8, 192], strides = [1, 1]} : vector<8x256xf32> to vector<8x192xf32>
    %146 = arith.negf %145 : vector<8x192xf32>
    %147 = math.exp %146 : vector<8x192xf32>
    %cst_22 = arith.constant 1.000000e+00 : f32
    %148 = vector.broadcast %cst_22 : f32 to vector<8x192xf32>
    %149 = arith.addf %148, %147 : vector<8x192xf32>
    %150 = arith.divf %148, %149 : vector<8x192xf32>
    %151 = vector.extract_strided_slice %144 {offsets = [0, 192], sizes = [8, 64], strides = [1, 1]} : vector<8x256xf32> to vector<8x64xf32>
    %152 = math.tanh %151 : vector<8x64xf32>
    %153 = vector.extract_strided_slice %150 {offsets = [0, 64], sizes = [8, 64], strides = [1, 1]} : vector<8x192xf32> to vector<8x64xf32>
    %154 = arith.mulf %153, %138 : vector<8x64xf32>
    %155 = vector.extract_strided_slice %150 {offsets = [0, 0], sizes = [8, 64], strides = [1, 1]} : vector<8x192xf32> to vector<8x64xf32>
    %156 = arith.mulf %155, %152 : vector<8x64xf32>
    %157 = arith.addf %154, %156 : vector<8x64xf32>
    %158 = vector.extract_strided_slice %150 {offsets = [0, 128], sizes = [8, 64], strides = [1, 1]} : vector<8x192xf32> to vector<8x64xf32>
    %159 = math.tanh %157 : vector<8x64xf32>
    %160 = arith.mulf %158, %159 : vector<8x64xf32>
    %161 = tpu.concatenate %27, %46, %65, %84, %103, %122, %141, %160 in 0 : vector<8x64xf32>, vector<8x64xf32>, vector<8x64xf32>, vector<8x64xf32>, vector<8x64xf32>, vector<8x64xf32>, vector<8x64xf32>, vector<8x64xf32> -> vector<64x64xf32>
    %162 = tpu.concatenate %160, %141, %122, %103, %84, %65, %46, %27 in 0 : vector<8x64xf32>, vector<8x64xf32>, vector<8x64xf32>, vector<8x64xf32>, vector<8x64xf32>, vector<8x64xf32>, vector<8x64xf32>, vector<8x64xf32> -> vector<64x64xf32>
    %c136 = arith.constant 136 : index
    %c0_23 = arith.constant 0 : index
    %163 = vector.load %arg1[%c136, %c0_23] : memref<656x256xf32, #tpu.memory_space<vmem>>, vector<64x256xf32>
    %cst_24 = arith.constant dense<0.000000e+00> : vector<64x256xf32>
    %164 = tpu.matmul %161, %163, %cst_24 {dimension_numbers = #tpu.dot_dimension_numbers<[1], [0], [0], [1], [0, 0, 1, 1], [], []>} : vector<64x64xf32>, vector<64x256xf32>, vector<64x256xf32> -> vector<64x256xf32>
    %c200 = arith.constant 200 : index
    %c0_25 = arith.constant 0 : index
    %165 = vector.load %arg1[%c200, %c0_25] : memref<656x256xf32, #tpu.memory_space<vmem>>, vector<64x256xf32>
    %cst_26 = arith.constant dense<0.000000e+00> : vector<64x256xf32>
    %166 = tpu.matmul %162, %165, %cst_26 {dimension_numbers = #tpu.dot_dimension_numbers<[1], [0], [0], [1], [0, 0, 1, 1], [], []>} : vector<64x64xf32>, vector<64x256xf32>, vector<64x256xf32> -> vector<64x256xf32>
    %167 = arith.addf %164, %166 : vector<64x256xf32>
    %c328 = arith.constant 328 : index
    %c0_27 = arith.constant 0 : index
    %168 = vector.load %arg1[%c328, %c0_27] : memref<656x256xf32, #tpu.memory_space<vmem>>, vector<1x256xf32>
    %169 = vector.broadcast %168 : vector<1x256xf32> to vector<64x256xf32>
    %170 = arith.addf %167, %169 : vector<64x256xf32>
    %c264 = arith.constant 264 : index
    %c0_28 = arith.constant 0 : index
    %171 = vector.load %arg1[%c264, %c0_28] : memref<656x256xf32, #tpu.memory_space<vmem>>, vector<64x256xf32>
    %cst_29 = arith.constant 0.000000e+00 : f32
    %172 = vector.broadcast %cst_29 : f32 to vector<8x64xf32>
    %cst_30 = arith.constant 0.000000e+00 : f32
    %173 = vector.broadcast %cst_30 : f32 to vector<8x64xf32>
    %174 = vector.extract_strided_slice %170 {offsets = [0, 0], sizes = [8, 256], strides = [1, 1]} : vector<64x256xf32> to vector<8x256xf32>
    %cst_31 = arith.constant dense<0.000000e+00> : vector<8x256xf32>
    %175 = tpu.matmul %172, %171, %cst_31 {dimension_numbers = #tpu.dot_dimension_numbers<[1], [0], [0], [1], [0, 0, 1, 1], [], []>} : vector<8x64xf32>, vector<64x256xf32>, vector<8x256xf32> -> vector<8x256xf32>
    %176 = arith.addf %174, %175 : vector<8x256xf32>
    %177 = vector.extract_strided_slice %176 {offsets = [0, 0], sizes = [8, 192], strides = [1, 1]} : vector<8x256xf32> to vector<8x192xf32>
    %178 = arith.negf %177 : vector<8x192xf32>
    %179 = math.exp %178 : vector<8x192xf32>
    %cst_32 = arith.constant 1.000000e+00 : f32
    %180 = vector.broadcast %cst_32 : f32 to vector<8x192xf32>
    %181 = arith.addf %180, %179 : vector<8x192xf32>
    %182 = arith.divf %180, %181 : vector<8x192xf32>
    %183 = vector.extract_strided_slice %176 {offsets = [0, 192], sizes = [8, 64], strides = [1, 1]} : vector<8x256xf32> to vector<8x64xf32>
    %184 = math.tanh %183 : vector<8x64xf32>
    %185 = vector.extract_strided_slice %182 {offsets = [0, 64], sizes = [8, 64], strides = [1, 1]} : vector<8x192xf32> to vector<8x64xf32>
    %186 = arith.mulf %185, %173 : vector<8x64xf32>
    %187 = vector.extract_strided_slice %182 {offsets = [0, 0], sizes = [8, 64], strides = [1, 1]} : vector<8x192xf32> to vector<8x64xf32>
    %188 = arith.mulf %187, %184 : vector<8x64xf32>
    %189 = arith.addf %186, %188 : vector<8x64xf32>
    %190 = vector.extract_strided_slice %182 {offsets = [0, 128], sizes = [8, 64], strides = [1, 1]} : vector<8x192xf32> to vector<8x64xf32>
    %191 = math.tanh %189 : vector<8x64xf32>
    %192 = arith.mulf %190, %191 : vector<8x64xf32>
    %193 = vector.extract_strided_slice %170 {offsets = [8, 0], sizes = [8, 256], strides = [1, 1]} : vector<64x256xf32> to vector<8x256xf32>
    %cst_33 = arith.constant dense<0.000000e+00> : vector<8x256xf32>
    %194 = tpu.matmul %192, %171, %cst_33 {dimension_numbers = #tpu.dot_dimension_numbers<[1], [0], [0], [1], [0, 0, 1, 1], [], []>} : vector<8x64xf32>, vector<64x256xf32>, vector<8x256xf32> -> vector<8x256xf32>
    %195 = arith.addf %193, %194 : vector<8x256xf32>
    %196 = vector.extract_strided_slice %195 {offsets = [0, 0], sizes = [8, 192], strides = [1, 1]} : vector<8x256xf32> to vector<8x192xf32>
    %197 = arith.negf %196 : vector<8x192xf32>
    %198 = math.exp %197 : vector<8x192xf32>
    %cst_34 = arith.constant 1.000000e+00 : f32
    %199 = vector.broadcast %cst_34 : f32 to vector<8x192xf32>
    %200 = arith.addf %199, %198 : vector<8x192xf32>
    %201 = arith.divf %199, %200 : vector<8x192xf32>
    %202 = vector.extract_strided_slice %195 {offsets = [0, 192], sizes = [8, 64], strides = [1, 1]} : vector<8x256xf32> to vector<8x64xf32>
    %203 = math.tanh %202 : vector<8x64xf32>
    %204 = vector.extract_strided_slice %201 {offsets = [0, 64], sizes = [8, 64], strides = [1, 1]} : vector<8x192xf32> to vector<8x64xf32>
    %205 = arith.mulf %204, %189 : vector<8x64xf32>
    %206 = vector.extract_strided_slice %201 {offsets = [0, 0], sizes = [8, 64], strides = [1, 1]} : vector<8x192xf32> to vector<8x64xf32>
    %207 = arith.mulf %206, %203 : vector<8x64xf32>
    %208 = arith.addf %205, %207 : vector<8x64xf32>
    %209 = vector.extract_strided_slice %201 {offsets = [0, 128], sizes = [8, 64], strides = [1, 1]} : vector<8x192xf32> to vector<8x64xf32>
    %210 = math.tanh %208 : vector<8x64xf32>
    %211 = arith.mulf %209, %210 : vector<8x64xf32>
    %212 = vector.extract_strided_slice %170 {offsets = [16, 0], sizes = [8, 256], strides = [1, 1]} : vector<64x256xf32> to vector<8x256xf32>
    %cst_35 = arith.constant dense<0.000000e+00> : vector<8x256xf32>
    %213 = tpu.matmul %211, %171, %cst_35 {dimension_numbers = #tpu.dot_dimension_numbers<[1], [0], [0], [1], [0, 0, 1, 1], [], []>} : vector<8x64xf32>, vector<64x256xf32>, vector<8x256xf32> -> vector<8x256xf32>
    %214 = arith.addf %212, %213 : vector<8x256xf32>
    %215 = vector.extract_strided_slice %214 {offsets = [0, 0], sizes = [8, 192], strides = [1, 1]} : vector<8x256xf32> to vector<8x192xf32>
    %216 = arith.negf %215 : vector<8x192xf32>
    %217 = math.exp %216 : vector<8x192xf32>
    %cst_36 = arith.constant 1.000000e+00 : f32
    %218 = vector.broadcast %cst_36 : f32 to vector<8x192xf32>
    %219 = arith.addf %218, %217 : vector<8x192xf32>
    %220 = arith.divf %218, %219 : vector<8x192xf32>
    %221 = vector.extract_strided_slice %214 {offsets = [0, 192], sizes = [8, 64], strides = [1, 1]} : vector<8x256xf32> to vector<8x64xf32>
    %222 = math.tanh %221 : vector<8x64xf32>
    %223 = vector.extract_strided_slice %220 {offsets = [0, 64], sizes = [8, 64], strides = [1, 1]} : vector<8x192xf32> to vector<8x64xf32>
    %224 = arith.mulf %223, %208 : vector<8x64xf32>
    %225 = vector.extract_strided_slice %220 {offsets = [0, 0], sizes = [8, 64], strides = [1, 1]} : vector<8x192xf32> to vector<8x64xf32>
    %226 = arith.mulf %225, %222 : vector<8x64xf32>
    %227 = arith.addf %224, %226 : vector<8x64xf32>
    %228 = vector.extract_strided_slice %220 {offsets = [0, 128], sizes = [8, 64], strides = [1, 1]} : vector<8x192xf32> to vector<8x64xf32>
    %229 = math.tanh %227 : vector<8x64xf32>
    %230 = arith.mulf %228, %229 : vector<8x64xf32>
    %231 = vector.extract_strided_slice %170 {offsets = [24, 0], sizes = [8, 256], strides = [1, 1]} : vector<64x256xf32> to vector<8x256xf32>
    %cst_37 = arith.constant dense<0.000000e+00> : vector<8x256xf32>
    %232 = tpu.matmul %230, %171, %cst_37 {dimension_numbers = #tpu.dot_dimension_numbers<[1], [0], [0], [1], [0, 0, 1, 1], [], []>} : vector<8x64xf32>, vector<64x256xf32>, vector<8x256xf32> -> vector<8x256xf32>
    %233 = arith.addf %231, %232 : vector<8x256xf32>
    %234 = vector.extract_strided_slice %233 {offsets = [0, 0], sizes = [8, 192], strides = [1, 1]} : vector<8x256xf32> to vector<8x192xf32>
    %235 = arith.negf %234 : vector<8x192xf32>
    %236 = math.exp %235 : vector<8x192xf32>
    %cst_38 = arith.constant 1.000000e+00 : f32
    %237 = vector.broadcast %cst_38 : f32 to vector<8x192xf32>
    %238 = arith.addf %237, %236 : vector<8x192xf32>
    %239 = arith.divf %237, %238 : vector<8x192xf32>
    %240 = vector.extract_strided_slice %233 {offsets = [0, 192], sizes = [8, 64], strides = [1, 1]} : vector<8x256xf32> to vector<8x64xf32>
    %241 = math.tanh %240 : vector<8x64xf32>
    %242 = vector.extract_strided_slice %239 {offsets = [0, 64], sizes = [8, 64], strides = [1, 1]} : vector<8x192xf32> to vector<8x64xf32>
    %243 = arith.mulf %242, %227 : vector<8x64xf32>
    %244 = vector.extract_strided_slice %239 {offsets = [0, 0], sizes = [8, 64], strides = [1, 1]} : vector<8x192xf32> to vector<8x64xf32>
    %245 = arith.mulf %244, %241 : vector<8x64xf32>
    %246 = arith.addf %243, %245 : vector<8x64xf32>
    %247 = vector.extract_strided_slice %239 {offsets = [0, 128], sizes = [8, 64], strides = [1, 1]} : vector<8x192xf32> to vector<8x64xf32>
    %248 = math.tanh %246 : vector<8x64xf32>
    %249 = arith.mulf %247, %248 : vector<8x64xf32>
    %250 = vector.extract_strided_slice %170 {offsets = [32, 0], sizes = [8, 256], strides = [1, 1]} : vector<64x256xf32> to vector<8x256xf32>
    %cst_39 = arith.constant dense<0.000000e+00> : vector<8x256xf32>
    %251 = tpu.matmul %249, %171, %cst_39 {dimension_numbers = #tpu.dot_dimension_numbers<[1], [0], [0], [1], [0, 0, 1, 1], [], []>} : vector<8x64xf32>, vector<64x256xf32>, vector<8x256xf32> -> vector<8x256xf32>
    %252 = arith.addf %250, %251 : vector<8x256xf32>
    %253 = vector.extract_strided_slice %252 {offsets = [0, 0], sizes = [8, 192], strides = [1, 1]} : vector<8x256xf32> to vector<8x192xf32>
    %254 = arith.negf %253 : vector<8x192xf32>
    %255 = math.exp %254 : vector<8x192xf32>
    %cst_40 = arith.constant 1.000000e+00 : f32
    %256 = vector.broadcast %cst_40 : f32 to vector<8x192xf32>
    %257 = arith.addf %256, %255 : vector<8x192xf32>
    %258 = arith.divf %256, %257 : vector<8x192xf32>
    %259 = vector.extract_strided_slice %252 {offsets = [0, 192], sizes = [8, 64], strides = [1, 1]} : vector<8x256xf32> to vector<8x64xf32>
    %260 = math.tanh %259 : vector<8x64xf32>
    %261 = vector.extract_strided_slice %258 {offsets = [0, 64], sizes = [8, 64], strides = [1, 1]} : vector<8x192xf32> to vector<8x64xf32>
    %262 = arith.mulf %261, %246 : vector<8x64xf32>
    %263 = vector.extract_strided_slice %258 {offsets = [0, 0], sizes = [8, 64], strides = [1, 1]} : vector<8x192xf32> to vector<8x64xf32>
    %264 = arith.mulf %263, %260 : vector<8x64xf32>
    %265 = arith.addf %262, %264 : vector<8x64xf32>
    %266 = vector.extract_strided_slice %258 {offsets = [0, 128], sizes = [8, 64], strides = [1, 1]} : vector<8x192xf32> to vector<8x64xf32>
    %267 = math.tanh %265 : vector<8x64xf32>
    %268 = arith.mulf %266, %267 : vector<8x64xf32>
    %269 = vector.extract_strided_slice %170 {offsets = [40, 0], sizes = [8, 256], strides = [1, 1]} : vector<64x256xf32> to vector<8x256xf32>
    %cst_41 = arith.constant dense<0.000000e+00> : vector<8x256xf32>
    %270 = tpu.matmul %268, %171, %cst_41 {dimension_numbers = #tpu.dot_dimension_numbers<[1], [0], [0], [1], [0, 0, 1, 1], [], []>} : vector<8x64xf32>, vector<64x256xf32>, vector<8x256xf32> -> vector<8x256xf32>
    %271 = arith.addf %269, %270 : vector<8x256xf32>
    %272 = vector.extract_strided_slice %271 {offsets = [0, 0], sizes = [8, 192], strides = [1, 1]} : vector<8x256xf32> to vector<8x192xf32>
    %273 = arith.negf %272 : vector<8x192xf32>
    %274 = math.exp %273 : vector<8x192xf32>
    %cst_42 = arith.constant 1.000000e+00 : f32
    %275 = vector.broadcast %cst_42 : f32 to vector<8x192xf32>
    %276 = arith.addf %275, %274 : vector<8x192xf32>
    %277 = arith.divf %275, %276 : vector<8x192xf32>
    %278 = vector.extract_strided_slice %271 {offsets = [0, 192], sizes = [8, 64], strides = [1, 1]} : vector<8x256xf32> to vector<8x64xf32>
    %279 = math.tanh %278 : vector<8x64xf32>
    %280 = vector.extract_strided_slice %277 {offsets = [0, 64], sizes = [8, 64], strides = [1, 1]} : vector<8x192xf32> to vector<8x64xf32>
    %281 = arith.mulf %280, %265 : vector<8x64xf32>
    %282 = vector.extract_strided_slice %277 {offsets = [0, 0], sizes = [8, 64], strides = [1, 1]} : vector<8x192xf32> to vector<8x64xf32>
    %283 = arith.mulf %282, %279 : vector<8x64xf32>
    %284 = arith.addf %281, %283 : vector<8x64xf32>
    %285 = vector.extract_strided_slice %277 {offsets = [0, 128], sizes = [8, 64], strides = [1, 1]} : vector<8x192xf32> to vector<8x64xf32>
    %286 = math.tanh %284 : vector<8x64xf32>
    %287 = arith.mulf %285, %286 : vector<8x64xf32>
    %288 = vector.extract_strided_slice %170 {offsets = [48, 0], sizes = [8, 256], strides = [1, 1]} : vector<64x256xf32> to vector<8x256xf32>
    %cst_43 = arith.constant dense<0.000000e+00> : vector<8x256xf32>
    %289 = tpu.matmul %287, %171, %cst_43 {dimension_numbers = #tpu.dot_dimension_numbers<[1], [0], [0], [1], [0, 0, 1, 1], [], []>} : vector<8x64xf32>, vector<64x256xf32>, vector<8x256xf32> -> vector<8x256xf32>
    %290 = arith.addf %288, %289 : vector<8x256xf32>
    %291 = vector.extract_strided_slice %290 {offsets = [0, 0], sizes = [8, 192], strides = [1, 1]} : vector<8x256xf32> to vector<8x192xf32>
    %292 = arith.negf %291 : vector<8x192xf32>
    %293 = math.exp %292 : vector<8x192xf32>
    %cst_44 = arith.constant 1.000000e+00 : f32
    %294 = vector.broadcast %cst_44 : f32 to vector<8x192xf32>
    %295 = arith.addf %294, %293 : vector<8x192xf32>
    %296 = arith.divf %294, %295 : vector<8x192xf32>
    %297 = vector.extract_strided_slice %290 {offsets = [0, 192], sizes = [8, 64], strides = [1, 1]} : vector<8x256xf32> to vector<8x64xf32>
    %298 = math.tanh %297 : vector<8x64xf32>
    %299 = vector.extract_strided_slice %296 {offsets = [0, 64], sizes = [8, 64], strides = [1, 1]} : vector<8x192xf32> to vector<8x64xf32>
    %300 = arith.mulf %299, %284 : vector<8x64xf32>
    %301 = vector.extract_strided_slice %296 {offsets = [0, 0], sizes = [8, 64], strides = [1, 1]} : vector<8x192xf32> to vector<8x64xf32>
    %302 = arith.mulf %301, %298 : vector<8x64xf32>
    %303 = arith.addf %300, %302 : vector<8x64xf32>
    %304 = vector.extract_strided_slice %296 {offsets = [0, 128], sizes = [8, 64], strides = [1, 1]} : vector<8x192xf32> to vector<8x64xf32>
    %305 = math.tanh %303 : vector<8x64xf32>
    %306 = arith.mulf %304, %305 : vector<8x64xf32>
    %307 = vector.extract_strided_slice %170 {offsets = [56, 0], sizes = [8, 256], strides = [1, 1]} : vector<64x256xf32> to vector<8x256xf32>
    %cst_45 = arith.constant dense<0.000000e+00> : vector<8x256xf32>
    %308 = tpu.matmul %306, %171, %cst_45 {dimension_numbers = #tpu.dot_dimension_numbers<[1], [0], [0], [1], [0, 0, 1, 1], [], []>} : vector<8x64xf32>, vector<64x256xf32>, vector<8x256xf32> -> vector<8x256xf32>
    %309 = arith.addf %307, %308 : vector<8x256xf32>
    %310 = vector.extract_strided_slice %309 {offsets = [0, 0], sizes = [8, 192], strides = [1, 1]} : vector<8x256xf32> to vector<8x192xf32>
    %311 = arith.negf %310 : vector<8x192xf32>
    %312 = math.exp %311 : vector<8x192xf32>
    %cst_46 = arith.constant 1.000000e+00 : f32
    %313 = vector.broadcast %cst_46 : f32 to vector<8x192xf32>
    %314 = arith.addf %313, %312 : vector<8x192xf32>
    %315 = arith.divf %313, %314 : vector<8x192xf32>
    %316 = vector.extract_strided_slice %309 {offsets = [0, 192], sizes = [8, 64], strides = [1, 1]} : vector<8x256xf32> to vector<8x64xf32>
    %317 = math.tanh %316 : vector<8x64xf32>
    %318 = vector.extract_strided_slice %315 {offsets = [0, 64], sizes = [8, 64], strides = [1, 1]} : vector<8x192xf32> to vector<8x64xf32>
    %319 = arith.mulf %318, %303 : vector<8x64xf32>
    %320 = vector.extract_strided_slice %315 {offsets = [0, 0], sizes = [8, 64], strides = [1, 1]} : vector<8x192xf32> to vector<8x64xf32>
    %321 = arith.mulf %320, %317 : vector<8x64xf32>
    %322 = arith.addf %319, %321 : vector<8x64xf32>
    %323 = vector.extract_strided_slice %315 {offsets = [0, 128], sizes = [8, 64], strides = [1, 1]} : vector<8x192xf32> to vector<8x64xf32>
    %324 = math.tanh %322 : vector<8x64xf32>
    %325 = arith.mulf %323, %324 : vector<8x64xf32>
    %326 = tpu.concatenate %192, %211, %230, %249, %268, %287, %306, %325 in 0 : vector<8x64xf32>, vector<8x64xf32>, vector<8x64xf32>, vector<8x64xf32>, vector<8x64xf32>, vector<8x64xf32>, vector<8x64xf32>, vector<8x64xf32> -> vector<64x64xf32>
    %327 = tpu.concatenate %325, %306, %287, %268, %249, %230, %211, %192 in 0 : vector<8x64xf32>, vector<8x64xf32>, vector<8x64xf32>, vector<8x64xf32>, vector<8x64xf32>, vector<8x64xf32>, vector<8x64xf32>, vector<8x64xf32> -> vector<64x64xf32>
    %c336 = arith.constant 336 : index
    %c0_47 = arith.constant 0 : index
    %328 = vector.load %arg1[%c336, %c0_47] : memref<656x256xf32, #tpu.memory_space<vmem>>, vector<64x64xf32>
    %cst_48 = arith.constant dense<0.000000e+00> : vector<64x64xf32>
    %329 = tpu.matmul %326, %328, %cst_48 {dimension_numbers = #tpu.dot_dimension_numbers<[1], [0], [0], [1], [0, 0, 1, 1], [], []>} : vector<64x64xf32>, vector<64x64xf32>, vector<64x64xf32> -> vector<64x64xf32>
    %c400 = arith.constant 400 : index
    %c0_49 = arith.constant 0 : index
    %330 = vector.load %arg1[%c400, %c0_49] : memref<656x256xf32, #tpu.memory_space<vmem>>, vector<64x64xf32>
    %cst_50 = arith.constant dense<0.000000e+00> : vector<64x64xf32>
    %331 = tpu.matmul %327, %330, %cst_50 {dimension_numbers = #tpu.dot_dimension_numbers<[1], [0], [0], [1], [0, 0, 1, 1], [], []>} : vector<64x64xf32>, vector<64x64xf32>, vector<64x64xf32> -> vector<64x64xf32>
    %332 = arith.addf %329, %331 : vector<64x64xf32>
    %c464 = arith.constant 464 : index
    %c0_51 = arith.constant 0 : index
    %333 = vector.load %arg1[%c464, %c0_51] : memref<656x256xf32, #tpu.memory_space<vmem>>, vector<1x64xf32>
    %334 = vector.broadcast %333 : vector<1x64xf32> to vector<64x64xf32>
    %335 = arith.addf %332, %334 : vector<64x64xf32>
    %336 = math.tanh %335 : vector<64x64xf32>
    %c472 = arith.constant 472 : index
    %c0_52 = arith.constant 0 : index
    %337 = vector.load %arg1[%c472, %c0_52] : memref<656x256xf32, #tpu.memory_space<vmem>>, vector<1x64xf32>
    %338 = vector.shape_cast %336 : vector<64x64xf32> to vector<8x8x64xf32>
    %339 = vector.shape_cast %337 : vector<1x64xf32> to vector<1x1x64xf32>
    %340 = vector.broadcast %339 : vector<1x1x64xf32> to vector<8x8x64xf32>
    %341 = arith.mulf %338, %340 : vector<8x8x64xf32>
    %cst_53 = arith.constant dense<0.000000e+00> : vector<8x8xf32>
    %342 = vector.multi_reduction <add>, %341, %cst_53 [2] : vector<8x8x64xf32> to vector<8x8xf32>
    %343 = vector.shape_cast %342 : vector<8x8xf32> to vector<8x8x1xf32>
    %cst_54 = arith.constant dense<0xFF800000> : vector<8x1xf32>
    %344 = vector.multi_reduction <maximumf>, %343, %cst_54 [0] : vector<8x8x1xf32> to vector<8x1xf32>
    %345 = vector.shape_cast %344 : vector<8x1xf32> to vector<1x8x1xf32>
    %346 = vector.broadcast %345 : vector<1x8x1xf32> to vector<8x8x1xf32>
    %347 = arith.subf %343, %346 : vector<8x8x1xf32>
    %348 = math.exp %347 : vector<8x8x1xf32>
    %cst_55 = arith.constant dense<0.000000e+00> : vector<8x1xf32>
    %349 = vector.multi_reduction <add>, %348, %cst_55 [0] : vector<8x8x1xf32> to vector<8x1xf32>
    %350 = vector.shape_cast %349 : vector<8x1xf32> to vector<1x8x1xf32>
    %351 = tpu.reciprocal %350 {approx = true} : vector<1x8x1xf32> -> vector<1x8x1xf32>
    %352 = vector.broadcast %351 : vector<1x8x1xf32> to vector<8x8x1xf32>
    %353 = arith.mulf %348, %352 : vector<8x8x1xf32>
    %354 = vector.shape_cast %326 : vector<64x64xf32> to vector<8x8x64xf32>
    %355 = vector.broadcast %353 : vector<8x8x1xf32> to vector<8x8x64xf32>
    %356 = arith.mulf %355, %354 : vector<8x8x64xf32>
    %cst_56 = arith.constant dense<0.000000e+00> : vector<8x64xf32>
    %357 = vector.multi_reduction <add>, %356, %cst_56 [0] : vector<8x8x64xf32> to vector<8x64xf32>
    %358 = vector.shape_cast %327 : vector<64x64xf32> to vector<8x8x64xf32>
    %359 = vector.broadcast %353 : vector<8x8x1xf32> to vector<8x8x64xf32>
    %360 = arith.mulf %359, %358 : vector<8x8x64xf32>
    %cst_57 = arith.constant dense<0.000000e+00> : vector<8x64xf32>
    %361 = vector.multi_reduction <add>, %360, %cst_57 [0] : vector<8x8x64xf32> to vector<8x64xf32>
    %c480 = arith.constant 480 : index
    %c0_58 = arith.constant 0 : index
    %362 = vector.load %arg1[%c480, %c0_58] : memref<656x256xf32, #tpu.memory_space<vmem>>, vector<64x32xf32>
    %cst_59 = arith.constant dense<0.000000e+00> : vector<8x32xf32>
    %363 = tpu.matmul %357, %362, %cst_59 {dimension_numbers = #tpu.dot_dimension_numbers<[1], [0], [0], [1], [0, 0, 1, 1], [], []>} : vector<8x64xf32>, vector<64x32xf32>, vector<8x32xf32> -> vector<8x32xf32>
    %c544 = arith.constant 544 : index
    %c0_60 = arith.constant 0 : index
    %364 = vector.load %arg1[%c544, %c0_60] : memref<656x256xf32, #tpu.memory_space<vmem>>, vector<64x32xf32>
    %cst_61 = arith.constant dense<0.000000e+00> : vector<8x32xf32>
    %365 = tpu.matmul %361, %364, %cst_61 {dimension_numbers = #tpu.dot_dimension_numbers<[1], [0], [0], [1], [0, 0, 1, 1], [], []>} : vector<8x64xf32>, vector<64x32xf32>, vector<8x32xf32> -> vector<8x32xf32>
    %366 = arith.addf %363, %365 : vector<8x32xf32>
    %c608 = arith.constant 608 : index
    %c0_62 = arith.constant 0 : index
    %367 = vector.load %arg1[%c608, %c0_62] : memref<656x256xf32, #tpu.memory_space<vmem>>, vector<1x32xf32>
    %368 = vector.broadcast %367 : vector<1x32xf32> to vector<8x32xf32>
    %369 = arith.addf %366, %368 : vector<8x32xf32>
    %cst_63 = arith.constant 0.000000e+00 : f32
    %370 = vector.broadcast %cst_63 : f32 to vector<8x32xf32>
    %371 = arith.maximumf %369, %370 : vector<8x32xf32>
    %c616 = arith.constant 616 : index
    %c0_64 = arith.constant 0 : index
    %372 = vector.load %arg1[%c616, %c0_64] : memref<656x256xf32, #tpu.memory_space<vmem>>, vector<32x2xf32>
    %cst_65 = arith.constant dense<0.000000e+00> : vector<8x2xf32>
    %373 = tpu.matmul %371, %372, %cst_65 {dimension_numbers = #tpu.dot_dimension_numbers<[1], [0], [0], [1], [0, 0, 1, 1], [], []>} : vector<8x32xf32>, vector<32x2xf32>, vector<8x2xf32> -> vector<8x2xf32>
    %c648 = arith.constant 648 : index
    %c0_66 = arith.constant 0 : index
    %374 = vector.load %arg1[%c648, %c0_66] : memref<656x256xf32, #tpu.memory_space<vmem>>, vector<1x2xf32>
    %375 = vector.broadcast %374 : vector<1x2xf32> to vector<8x2xf32>
    %376 = arith.addf %373, %375 : vector<8x2xf32>
    %377 = vector.shape_cast %353 : vector<8x8x1xf32> to vector<64x1xf32>
    %cst_67 = arith.constant 0.000000e+00 : f32
    %378 = vector.broadcast %cst_67 : f32 to vector<56x2xf32>
    %379 = tpu.concatenate %376, %378 in 0 : vector<8x2xf32>, vector<56x2xf32> -> vector<64x2xf32>
    %cst_68 = arith.constant 0.000000e+00 : f32
    %380 = vector.broadcast %cst_68 : f32 to vector<64x7xf32>
    %cst_69 = arith.constant 0.000000e+00 : f32
    %381 = vector.broadcast %cst_69 : f32 to vector<64x118xf32>
    %382 = tpu.concatenate %377, %380, %379, %381 in 1 : vector<64x1xf32>, vector<64x7xf32>, vector<64x2xf32>, vector<64x118xf32> -> vector<64x128xf32>
    %c0_70 = arith.constant 0 : index
    %c0_71 = arith.constant 0 : index
    %383 = vector.load %arg2[%c0_70, %c0_71] : memref<64x128xf32, #tpu.memory_space<vmem>>, vector<64x128xf32>
    tpu.vector_store %arg2[%c0_70, %c0_71], %382 {strides = array<i32>} : memref<64x128xf32, #tpu.memory_space<vmem>>, vector<64x128xf32>,
    return
  }
}

</mosaic_0001>

<bundles_post_ra>
// kernel: squeeze.1
= control target key start
LH: loop header
LB: loop body
LE: loop exit
PB: predicated region body
PF: predicated region fallthrough
CT: control target
= control target key end

     0   :  { %s66_s8 = smov 104   ;;  %vm7_vm0 = vcmask 64512   ;;  %s67_s11 = smov 112   ;;  %s117_s0 = inlined_call_operand.vmem [shape: f32[64], index: 0, kind: input, shape index: {}]   ;;  %s118_s1 = inlined_call_operand.vmem [shape: f32[8,8], index: 1, kind: output, shape index: {}]  }
   0x1   :  { %v4_v0 = vld [vmem:[%s117_s0] sm:$0x1]  ;;  %s65_s0 = smov 120   ;;  %s68_s12 = smov 96  }
   0x2   :  { %5 = vst [vmem:[#allocation0] sm:$0x1] %v4_v0  ;;  %s69_s13 = smov 88   ;;  %s70_s14 = smov 80  }
   0x3   :  { %s71_s15 = smov 72  }
   0x9   :  { %v9_v1 = vld [vmem:[#allocation0] sm:$0x1]  }
   0xa   :  { %v21_v2 = vld [vmem:[#allocation0] sm:$0x1]   ;;  %10 = vrot.lane.b32.xlu0 %v9_v1, %s65_s0 }
   0xb   :  { %22 = vrot.lane.b32.xlu1 %v21_v2, %s66_s8  ;;  %v15_v3 = vld [vmem:[#allocation0] sm:$0x1]  }
   0xc   :  { %v27_v4 = vld [vmem:[#allocation0] sm:$0x1]  }
   0xd   :  { %v6_v5 = vld [vmem:[#allocation0] sm:$0x1]  }
   0xe   :  { %8 = vst.msk [vmem:[%s118_s1] sm:$0x1] %vm7_vm0, %v6_v5   ;;  %16 = vrot.lane.b32.xlu0 %v15_v3, %s67_s11  ;;  %v33_v6 = vld [vmem:[#allocation0] sm:$0x1]  }
   0xf   :  { %28 = vrot.lane.b32.xlu1 %v27_v4, %s68_s12  ;;  %v39_v7 = vld [vmem:[#allocation0] sm:$0x1]  }
  0x10   :  { %v45_v8 = vld [vmem:[#allocation0] sm:$0x1]  }
  0x12   :  { %34 = vrot.lane.b32.xlu0 %v33_v6, %s69_s13 }
  0x13   :  { %40 = vrot.lane.b32.xlu1 %v39_v7, %s70_s14 }
  0x16   :  { %46 = vrot.lane.b32.xlu0 %v45_v8, %s71_s15 }
  0x7c   :  { %v11_v9 = vpop.permute.xlu0 %10  }
  0x7d   :  { %v23_v10 = vpop.permute.xlu1 %22   ;;  %51 = vst.msk [vmem:[%s118_s1 + $0x1] sm:$0x1] %vm7_vm0, %v11_v9  }
  0x7e   :  { %53 = vst.msk [vmem:[%s118_s1 + $0x3] sm:$0x1] %vm7_vm0, %v23_v10  }
  0x80   :  { %v17_v11 = vpop.permute.xlu0 %16  }
  0x81   :  { %v29_v12 = vpop.permute.xlu1 %28   ;;  %52 = vst.msk [vmem:[%s118_s1 + $0x2] sm:$0x1] %vm7_vm0, %v17_v11  }
  0x82   :  { %54 = vst.msk [vmem:[%s118_s1 + $0x4] sm:$0x1] %vm7_vm0, %v29_v12  }
  0x84   :  { %v35_v13 = vpop.permute.xlu0 %34  }
  0x85   :  { %v41_v14 = vpop.permute.xlu1 %40   ;;  %55 = vst.msk [vmem:[%s118_s1 + $0x5] sm:$0x1] %vm7_vm0, %v35_v13  }
  0x86   :  { %56 = vst.msk [vmem:[%s118_s1 + $0x6] sm:$0x1] %vm7_vm0, %v41_v14  }
  0x88   :  { %v47_v15 = vpop.permute.xlu0 %46  }
  0x89   :  { %57 = vst.msk [vmem:[%s118_s1 + $0x7] sm:$0x1] %vm7_vm0, %v47_v15  }

// kernel: hybrid_forward.1
= control target key start
LH: loop header
LB: loop body
LE: loop exit
PB: predicated region body
PF: predicated region fallthrough
CT: control target
= control target key end

     0   :  { %7 = vsyncpa [#allocation3], 0  ;;  %s3839_s9 = smov [#allocation2]   ;;  %s4461_s0 = inlined_call_operand.vmem [shape: f32[64,64], index: 0, kind: input, shape index: {}]   ;;  %s4462_s1 = inlined_call_operand.hbm [shape: f32[656,256], index: 1, kind: input, shape index: {}]   ;;  %s4463_s2 = inlined_call_operand.vmem [shape: f32[64,128], index: 2, kind: output, shape index: {}]  }
   0x1   :  { %s15_s10 = sshll.u32 %s3839_s9, 4  ;;  %s3815_s13 = scalar_lea.hbm %s4462_s1, 20992  ;;  %s16_s10 = int_to_ptr.vmem [resolvable:$true] %s15_s10 }
   0x2   :  { %p3816_p0 = scmp.ne.s32.totalorder %s4462_s1, %s3815_s13  ;;  %p3819_p1 = scmp.lt.u32.totalorder %s3815_s13, %s4462_s1 }
   0x4   :  { %p3821_p2 = pnand %p3819_p1, %p3816_p0 }
   0x6   :  { %3824 = shalt.err (!%p3821_p2)
}
   0x7   :  { %s3825_s18 = scalar_lea.vmem %s16_s10, 20992  ;;  %p3830_p4 = scmp.lt.s32.totalorder %s16_s10, %s16_s10 }
   0x8   :  { %p3826_p3 = scmp.ne.s32.totalorder %s16_s10, %s3825_s18  ;;  %p3831_p5 = scmp.lt.s32.totalorder %s3825_s18, %s3825_s18 }
   0xa   :  { %p3832_p6 = por %p3831_p5, %p3830_p4 }
   0xc   :  { %p3833_p7 = pnand %p3832_p6, %p3826_p3 }
   0xe   :  { %3836 = shalt.err (!%p3833_p7)
}
   0xf   :  { %s3840_s19 = smov 256   ;;  %s3841_s20 = smov 16  }
  0x10   :  { %21 = dma.hbm_to_vmem [thread:$0]  %s4462_s1, 20992, %s16_s10, [#allocation3], %s3840_s19, %s3840_s19, %s3841_s20  }
  0x11   :  { %3837 = dma.done.wait [#allocation3], 20992  }
  0x12   :  { %3838 = vsyncadd [#allocation3], 4294946304  ;;  %v3842_v0 = vmov 0.0   ;;  %v34_v1 = vld [vmem:[#allocation2 + $0x8] sm:$0xff]  ;;  %v36_v2 = vld [vmem:[#allocation2 + $0x18] sm:$0xff]  ;;  %vm62_vm0 = vcmask 523264   ;;  %v52_v57 = vlaneseq }
  0x13   :  { %151 = vmatprep.mubr.f32.mxu0 %v3842_v0  ;;  %1163 = vmatprep.mubr.f32.mxu1 %v3842_v0  ;;  %v33_v3 = vld [vmem:[#allocation2] sm:$0xff]  ;;  %v3127_v4 = vpack.c.bf16 %v36_v2, %v34_v1  ;;  %v35_v5 = vld [vmem:[#allocation2 + $0x10] sm:$0xff]  ;;  %v38_v6 = vld [vmem:[#allocation2 + $0x28] sm:$0xff]  ;;  %s3844_s10 = smov 8   ;;  %vm3846_vm1 = vmmov 0   ;;  %vm2838_vm2 = vcmask 7168  }
  0x14   :  { %v40_v7 = vld [vmem:[#allocation2 + $0x38] sm:$0xff]  ;;  %v3129_v8 = vpack.c.bf16 %v35_v5, %v33_v3  ;;  %v37_v10 = vld [vmem:[#allocation2 + $0x20] sm:$0xff]  ;;  %v39_v11 = vld [vmem:[#allocation2 + $0x30] sm:$0xff]  ;;  %v3951_v58 = vshrl.u32 %v52_v57, 7  ;;  %vm2847_vm3 = vcmask 64512   ;;  %vm2856_vm4 = vcmask 80896  }
  0x15   :  { %v3131_v9 = vpack.c.bf16 %v40_v7, %v38_v6  ;;  %v42_v12 = vld [vmem:[#allocation2 + $0x48] sm:$0xff]  ;;  %3128 = vmatprep.subr.bf16.mxu0 %v3127_v4  ;;  %v44_v13 = vld [vmem:[#allocation2 + $0x58] sm:$0xff]  ;;  %v3133_v14 = vpack.c.bf16 %v39_v11, %v37_v10  ;;  %v41_v16 = vld [vmem:[#allocation2 + $0x40] sm:$0xff]  ;;  %vm2757_vm5 = vcmask 261120  }
  0x16   :  { %3130 = vmatpush1.bf16.msra.mxu0 %v3129_v8  ;;  %v3135_v15 = vpack.c.bf16 %v44_v13, %v42_v12  ;;  %v43_v17 = vld [vmem:[#allocation2 + $0x50] sm:$0xff]  ;;  %v46_v18 = vld [vmem:[#allocation2 + $0x68] sm:$0xff]  ;;  %v48_v19 = vld [vmem:[#allocation2 + $0x78] sm:$0xff]  ;;  %v58_v59 = vsub.s32 1, %v3951_v58  ;;  %v54_v3 = vsub.s32 0, %v3951_v58 }
  0x17   :  { %3132 = vmatprep.subr.bf16.mxu0 %v3131_v9  ;;  %v3137_v20 = vpack.c.bf16 %v43_v17, %v41_v16  ;;  %v3139_v21 = vpack.c.bf16 %v48_v19, %v46_v18  ;;  %v45_v22 = vld [vmem:[#allocation2 + $0x60] sm:$0xff]  ;;  %v47_v23 = vld [vmem:[#allocation2 + $0x70] sm:$0xff]  ;;  %v201_v24 = vld [vmem:[#allocation2 + $0x88] sm:$0xff] }
  0x18   :  { %v203_v25 = vld [vmem:[#allocation2 + $0x98] sm:$0xff]  ;;  %v3141_v26 = vpack.c.bf16 %v47_v23, %v45_v22  ;;  %v200_v28 = vld [vmem:[#allocation2 + $0x80] sm:$0xff]  ;;  %v202_v29 = vld [vmem:[#allocation2 + $0x90] sm:$0xff] }
  0x19   :  { %v3876_v27 = vpack.c.bf16 %v203_v25, %v201_v24  ;;  %v205_v30 = vld [vmem:[#allocation2 + $0xa8] sm:$0xff]  ;;  %v207_v31 = vld [vmem:[#allocation2 + $0xb8] sm:$0xff]  ;;  %v25_v32 = vld [vmem:[%s4461_s0] sm:$0xff]  ;;  %v3881_v33 = vpack.c.bf16 %v202_v29, %v200_v28 }
  0x1a   :  { %3134 = vmatpush1.bf16.msra.mxu0 %v3133_v14  ;;  %v3884_v34 = vpack.c.bf16 %v207_v31, %v205_v30  ;;  %v204_v35 = vld [vmem:[#allocation2 + $0xa0] sm:$0xff]  ;;  %v206_v36 = vld [vmem:[#allocation2 + $0xb0] sm:$0xff]  ;;  %v209_v37 = vld [vmem:[#allocation2 + $0xc8] sm:$0xff] }
  0x1b   :  { %3136 = vmatprep.subr.bf16.mxu0 %v3135_v15  ;;  %v211_v38 = vld [vmem:[#allocation2 + $0xd8] sm:$0xff]  ;;  %v26_v39 = vld [vmem:[%s4461_s0 + $0x8] sm:$0xff]  ;;  %v3892_v40 = vpack.c.bf16 %v206_v36, %v204_v35  ;;  %v208_v42 = vld [vmem:[#allocation2 + $0xc0] sm:$0xff] }
  0x1c   :  { %v3895_v41 = vpack.c.bf16 %v211_v38, %v209_v37  ;;  %v210_v43 = vld [vmem:[#allocation2 + $0xd0] sm:$0xff]  ;;  %v213_v44 = vld [vmem:[#allocation2 + $0xe8] sm:$0xff]  ;;  %v215_v45 = vld [vmem:[#allocation2 + $0xf8] sm:$0xff] }
  0x1d   :  { %v27_v46 = vld [vmem:[%s4461_s0 + $0x10] sm:$0xff]  ;;  %v3903_v47 = vpack.c.bf16 %v210_v43, %v208_v42  ;;  %v3906_v48 = vpack.c.bf16 %v215_v45, %v213_v44  ;;  %v212_v49 = vld [vmem:[#allocation2 + $0xe0] sm:$0xff]  ;;  %v28_v51 = vld [vmem:[%s4461_s0 + $0x18] sm:$0xff] }
  0x1e   :  { %3138 = vmatpush1.bf16.msra.mxu0 %v3137_v20  ;;  %v214_v50 = vld [vmem:[#allocation2 + $0xf0] sm:$0xff]  ;;  %v29_v53 = vld [vmem:[%s4461_s0 + $0x20] sm:$0xff]  ;;  %v30_v54 = vld [vmem:[%s4461_s0 + $0x28] sm:$0xff] }
  0x1f   :  { %3140 = vmatprep.subr.bf16.mxu0 %v3139_v21  ;;  %v3914_v52 = vpack.c.bf16 %v214_v50, %v212_v49  ;;  %v31_v55 = vld [vmem:[%s4461_s0 + $0x30] sm:$0xff]  ;;  %v32_v56 = vld [vmem:[%s4461_s0 + $0x38] sm:$0xff]  ;;  %v50_v60 = vld [vmem:[#allocation2 + $0x100] ss:$8 sm:$0x3]  ;;  %s3843_s0 = smov 64  }
  0x20   :  { %v3956_v61 = vrot.slane %v50_v60, %v58_v59  ;;  %v3963_v4 = vrot.slane %v50_v60, %v54_v3 }
  0x22   :  { %3142 = vmatpush1.bf16.msra.mxu0 %v3141_v26 }
  0x23   :  { %3144 = vmatprep.subr.bf16.mxu0 %v3876_v27 }
  0x25   :  { %2878 = vmatmul.mubr.msk.f32.vlgmr.msra.gmra.mrb[0].mxu0 %vm62_vm0, %v25_v32 }
  0x26   :  { %3146 = vmatpush1.bf16.msra.mxu0 %v3881_v33  ;;  %157 = vmatprep.mubr.f32.mxu0 %v3842_v0 }
  0x27   :  { %3148 = vmatprep.subr.bf16.mxu0 %v3884_v34 }
  0x29   :  { %2879 = vmatmul.mubr.msk.f32.gmra.mrb[2].mxu0 %vm62_vm0, %v26_v39 }
  0x2a   :  { %163 = vmatprep.mubr.f32.mxu0 %v3842_v0  ;;  %3150 = vmatpush1.bf16.msra.mxu0 %v3892_v40 }
  0x2b   :  { %3152 = vmatprep.subr.bf16.mxu0 %v3895_v41 }
  0x2d   :  { %2880 = vmatmul.mubr.msk.f32.gmra.mrb[4].mxu0 %vm62_vm0, %v27_v46 }
  0x2e   :  { %169 = vmatprep.mubr.f32.mxu0 %v3842_v0  ;;  %3154 = vmatpush1.bf16.msra.mxu0 %v3903_v47 }
  0x2f   :  { %3156 = vmatprep.subr.bf16.mxu0 %v3906_v48 }
  0x31   :  { %2881 = vmatmul.mubr.msk.f32.gmra.mrb[6].mxu0 %vm62_vm0, %v28_v51 }
  0x32   :  { %175 = vmatprep.mubr.f32.mxu0 %v3842_v0  ;;  %3158 = vmatpush1.bf16.msra.mxu0 %v3914_v52 }
  0x33   :  { %3160 = vmatprep.subr.bf16.mxu0 %v3876_v27 }
  0x35   :  { %2882 = vmatmul.mubr.msk.f32.gmra.mrb[8].mxu0 %vm62_vm0, %v29_v53 }
  0x36   :  { %181 = vmatprep.mubr.f32.mxu0 %v3842_v0 }
  0x39   :  { %2883 = vmatmul.mubr.msk.f32.gmra.mrb[10].mxu0 %vm62_vm0, %v30_v54 }
  0x3a   :  { %187 = vmatprep.mubr.f32.mxu0 %v3842_v0 }
  0x3d   :  { %2884 = vmatmul.mubr.msk.f32.gmra.mrb[12].mxu0 %vm62_vm0, %v31_v55 }
  0x3e   :  { %193 = vmatprep.mubr.f32.mxu0 %v3842_v0 }
  0x41   :  { %2885 = vmatmul.mubr.msk.f32.gmra.mrb[14].mxu0 %vm62_vm0, %v32_v56 }
  0x42   :  { %283 = vmatprep.mubr.f32.mxu0 %v3842_v0 }
  0x45   :  { %284 = vmatmul.mubr.f32.vlgmr.msra.gmra.mrb[0].mxu0 %v3842_v0 }
  0x46   :  { %3162 = vmatpush1.bf16.msra.mxu0 %v3881_v33  ;;  %389 = vmatprep.mubr.f32.mxu0 %v3842_v0 }
  0x47   :  { %3164 = vmatprep.subr.bf16.mxu0 %v3884_v34 }
  0x4a   :  { %3166 = vmatpush1.bf16.msra.mxu0 %v3892_v40 }
  0x4b   :  { %3168 = vmatprep.subr.bf16.mxu0 %v3895_v41 }
  0x4e   :  { %3170 = vmatpush1.bf16.msra.mxu0 %v3903_v47 }
  0x4f   :  { %3172 = vmatprep.subr.bf16.mxu0 %v3906_v48 }
  0x52   :  { %3174 = vmatpush1.bf16.msra.mxu0 %v3914_v52 }
  0x53   :  { %3176 = vmatprep.subr.bf16.mxu0 %v3876_v27 }
 0x118   :  { %v285_v62 = vpop.f32.mrb[0].mxu0 }
 0x119   :  { %v287_v63 = vpop.f32.mrb[1].mxu0  ;;  %v3493_v5 = vadd.f32 %v285_v62, %v3963_v4 }
 0x11a   :  { %v3494_v1 = vadd.f32 %v287_v63, %v3956_v61 }
 0x11b   :  { %v2886_v6 = vmul.f32 -1.442695, %v3493_v5 }
 0x11c   :  { %3589 = vtanh.f32 %v3494_v1  ;;  %v2887_v16 = vmul.f32 -1.442695, %v3494_v1 }
 0x11d   :  { %3591 = vpow2.f32 %v2886_v6 }
 0x126   :  { %v3590_v2 = vpop.eup %3589 }
 0x127   :  { %307 = vrot.lane.b32.xlu0 %v3590_v2, %s3843_s0  ;;  %v3592_v7 = vpop.eup %3591 }
 0x128   :  { %v298_v8 = vadd.f32 1.0, %v3592_v7 }
 0x12a   :  { %3593 = vrcp.f32 %v298_v8 }
 0x134   :  { %v3594_v9 = vpop.eup %3593 }
 0x135   :  { %v305_v12 = vmul.f32 0.0, %v3594_v9 }
 0x199   :  { %v308_v10 = vpop.permute.xlu0 %307 }
 0x19a   :  { %v310_v11 = vmul.f32 %v3594_v9, %v308_v10 }
 0x19c   :  { %312 = vrot.lane.b32.xlu0 %v310_v11, %s3843_s0 }
 0x20e   :  { %v313_v13 = vpop.permute.xlu0 %312 }
 0x20f   :  { %v315_v14 = vadd.f32 %v313_v13, %v305_v12 }
 0x211   :  { %3595 = vtanh.f32 %v315_v14 }
 0x212   :  { %3597 = vpow2.f32 %v2887_v16 }
 0x21b   :  { %v3596_v15 = vpop.eup %3595 }
 0x21c   :  { %318 = vrot.lane.b32.xlu1 %v3596_v15, %s3843_s0  ;;  %v3598_v17 = vpop.eup %3597 }
 0x21d   :  { %v299_v18 = vadd.f32 1.0, %v3598_v17 }
 0x21f   :  { %3599 = vrcp.f32 %v299_v18 }
 0x229   :  { %v3600_v19 = vpop.eup %3599 }
 0x28e   :  { %v319_v20 = vpop.permute.xlu1 %318 }
 0x28f   :  { %v3968_v21 = vmul.f32 %v3600_v19, %v319_v20 }
 0x291   :  { %2888 = vmatmul.mubr.msk.f32.vlgmr.msra.gmra.mrb[2].mxu0 %vm62_vm0, %v3968_v21 }
 0x292   :  { %3178 = vmatpush1.bf16.msra.mxu0 %v3881_v33  ;;  %495 = vmatprep.mubr.f32.mxu0 %v3842_v0 }
 0x293   :  { %3180 = vmatprep.subr.bf16.mxu0 %v3884_v34 }
 0x296   :  { %3182 = vmatpush1.bf16.msra.mxu0 %v3892_v40 }
 0x297   :  { %3184 = vmatprep.subr.bf16.mxu0 %v3895_v41 }
 0x29a   :  { %3186 = vmatpush1.bf16.msra.mxu0 %v3903_v47 }
 0x29b   :  { %3188 = vmatprep.subr.bf16.mxu0 %v3906_v48 }
 0x29e   :  { %3190 = vmatpush1.bf16.msra.mxu0 %v3914_v52 }
 0x29f   :  { %3192 = vmatprep.subr.bf16.mxu0 %v3876_v27 }
 0x364   :  { %v391_v22 = vpop.f32.mrb[2].mxu0 }
 0x365   :  { %v393_v23 = vpop.f32.mrb[3].mxu0  ;;  %v3495_v26 = vadd.f32 %v391_v22, %v3963_v4 }
 0x366   :  { %v3496_v24 = vadd.f32 %v393_v23, %v3956_v61 }
 0x367   :  { %v2889_v28 = vmul.f32 -1.442695, %v3495_v26 }
 0x368   :  { %3601 = vtanh.f32 %v3496_v24  ;;  %v2890_v42 = vmul.f32 -1.442695, %v3496_v24 }
 0x369   :  { %3603 = vpow2.f32 %v2889_v28 }
 0x372   :  { %v3602_v25 = vpop.eup %3601 }
 0x373   :  { %413 = vrot.lane.b32.xlu1 %v3602_v25, %s3843_s0  ;;  %v3604_v29 = vpop.eup %3603 }
 0x374   :  { %v404_v30 = vadd.f32 1.0, %v3604_v29 }
 0x376   :  { %3605 = vrcp.f32 %v404_v30 }
 0x380   :  { %v3606_v31 = vpop.eup %3605 }
 0x381   :  { %v411_v36 = vmul.f32 %v3606_v31, %v315_v14 }
 0x3e5   :  { %v414_v32 = vpop.permute.xlu1 %413 }
 0x3e6   :  { %v416_v35 = vmul.f32 %v3606_v31, %v414_v32 }
 0x3e8   :  { %418 = vrot.lane.b32.xlu0 %v416_v35, %s3843_s0 }
 0x45a   :  { %v419_v37 = vpop.permute.xlu0 %418 }
 0x45b   :  { %v421_v38 = vadd.f32 %v419_v37, %v411_v36 }
 0x45d   :  { %3607 = vtanh.f32 %v421_v38 }
 0x45e   :  { %3609 = vpow2.f32 %v2890_v42 }
 0x467   :  { %v3608_v39 = vpop.eup %3607 }
 0x468   :  { %424 = vrot.lane.b32.xlu1 %v3608_v39, %s3843_s0  ;;  %v3610_v43 = vpop.eup %3609 }
 0x469   :  { %v405_v44 = vadd.f32 1.0, %v3610_v43 }
 0x46b   :  { %3611 = vrcp.f32 %v405_v44 }
 0x475   :  { %v3612_v45 = vpop.eup %3611 }
 0x4da   :  { %v425_v46 = vpop.permute.xlu1 %424 }
 0x4db   :  { %v3986_v49 = vmul.f32 %v3612_v45, %v425_v46 }
 0x4dd   :  { %2891 = vmatmul.mubr.msk.f32.vlgmr.msra.gmra.mrb[4].mxu0 %vm62_vm0, %v3986_v49 }
 0x4de   :  { %3194 = vmatpush1.bf16.msra.mxu0 %v3881_v33  ;;  %601 = vmatprep.mubr.f32.mxu0 %v3842_v0 }
 0x4df   :  { %3196 = vmatprep.subr.bf16.mxu0 %v3884_v34 }
 0x4e2   :  { %3198 = vmatpush1.bf16.msra.mxu0 %v3892_v40 }
 0x4e3   :  { %3200 = vmatprep.subr.bf16.mxu0 %v3895_v41 }
 0x4e6   :  { %3202 = vmatpush1.bf16.msra.mxu0 %v3903_v47 }
 0x4e7   :  { %3204 = vmatprep.subr.bf16.mxu0 %v3906_v48 }
 0x4ea   :  { %3206 = vmatpush1.bf16.msra.mxu0 %v3914_v52 }
 0x4eb   :  { %3208 = vmatprep.subr.bf16.mxu0 %v3876_v27 }
 0x5b0   :  { %v497_v50 = vpop.f32.mrb[4].mxu0 }
 0x5b1   :  { %v499_v51 = vpop.f32.mrb[5].mxu0  ;;  %v3497_v55 = vadd.f32 %v497_v50, %v3963_v4 }
 0x5b2   :  { %v3498_v53 = vadd.f32 %v499_v51, %v3956_v61 }
 0x5b3   :  { %v2892_v56 = vmul.f32 -1.442695, %v3497_v55 }
 0x5b4   :  { %3613 = vtanh.f32 %v3498_v53  ;;  %v2893_v8 = vmul.f32 -1.442695, %v3498_v53 }
 0x5b5   :  { %3615 = vpow2.f32 %v2892_v56 }
 0x5be   :  { %v3614_v54 = vpop.eup %3613 }
 0x5bf   :  { %519 = vrot.lane.b32.xlu0 %v3614_v54, %s3843_s0  ;;  %v3616_v57 = vpop.eup %3615 }
 0x5c0   :  { %v510_v60 = vadd.f32 1.0, %v3616_v57 }
 0x5c2   :  { %3617 = vrcp.f32 %v510_v60 }
 0x5cc   :  { %v3618_v62 = vpop.eup %3617 }
 0x5cd   :  { %v517_v2 = vmul.f32 %v3618_v62, %v421_v38 }
 0x631   :  { %v520_v63 = vpop.permute.xlu0 %519 }
 0x632   :  { %v522_v1 = vmul.f32 %v3618_v62, %v520_v63 }
 0x634   :  { %524 = vrot.lane.b32.xlu1 %v522_v1, %s3843_s0 }
 0x6a6   :  { %v525_v5 = vpop.permute.xlu1 %524 }
 0x6a7   :  { %v527_v6 = vadd.f32 %v525_v5, %v517_v2 }
 0x6a9   :  { %3619 = vtanh.f32 %v527_v6 }
 0x6aa   :  { %3621 = vpow2.f32 %v2893_v8 }
 0x6b3   :  { %v3620_v7 = vpop.eup %3619 }
 0x6b4   :  { %530 = vrot.lane.b32.xlu0 %v3620_v7, %s3843_s0  ;;  %v3622_v9 = vpop.eup %3621 }
 0x6b5   :  { %v511_v10 = vadd.f32 1.0, %v3622_v9 }
 0x6b7   :  { %3623 = vrcp.f32 %v511_v10 }
 0x6c1   :  { %v3624_v11 = vpop.eup %3623 }
 0x726   :  { %v531_v12 = vpop.permute.xlu0 %530 }
 0x727   :  { %v4004_v13 = vmul.f32 %v3624_v11, %v531_v12 }
 0x729   :  { %2894 = vmatmul.mubr.msk.f32.vlgmr.msra.gmra.mrb[6].mxu0 %vm62_vm0, %v4004_v13 }
 0x72a   :  { %3210 = vmatpush1.bf16.msra.mxu0 %v3881_v33  ;;  %707 = vmatprep.mubr.f32.mxu0 %v3842_v0 }
 0x72b   :  { %3212 = vmatprep.subr.bf16.mxu0 %v3884_v34 }
 0x72e   :  { %3214 = vmatpush1.bf16.msra.mxu0 %v3892_v40 }
 0x72f   :  { %3216 = vmatprep.subr.bf16.mxu0 %v3895_v41 }
 0x732   :  { %3218 = vmatpush1.bf16.msra.mxu0 %v3903_v47 }
 0x733   :  { %3220 = vmatprep.subr.bf16.mxu0 %v3906_v48 }
 0x736   :  { %3222 = vmatpush1.bf16.msra.mxu0 %v3914_v52 }
 0x737   :  { %3224 = vmatprep.subr.bf16.mxu0 %v3876_v27 }
 0x7fc   :  { %v603_v14 = vpop.f32.mrb[6].mxu0 }
 0x7fd   :  { %v605_v15 = vpop.f32.mrb[7].mxu0  ;;  %v3499_v18 = vadd.f32 %v603_v14, %v3963_v4 }
 0x7fe   :  { %v3500_v16 = vadd.f32 %v605_v15, %v3956_v61 }
 0x7ff   :  { %v2895_v19 = vmul.f32 -1.442695, %v3499_v18 }
 0x800   :  { %3625 = vtanh.f32 %v3500_v16  ;;  %v2896_v31 = vmul.f32 -1.442695, %v3500_v16 }
 0x801   :  { %3627 = vpow2.f32 %v2895_v19 }
 0x80a   :  { %v3626_v17 = vpop.eup %3625 }
 0x80b   :  { %625 = vrot.lane.b32.xlu1 %v3626_v17, %s3843_s0  ;;  %v3628_v20 = vpop.eup %3627 }
 0x80c   :  { %v616_v22 = vadd.f32 1.0, %v3628_v20 }
 0x80e   :  { %3629 = vrcp.f32 %v616_v22 }
 0x818   :  { %v3630_v23 = vpop.eup %3629 }
 0x819   :  { %v623_v26 = vmul.f32 %v3630_v23, %v527_v6 }
 0x87d   :  { %v626_v24 = vpop.permute.xlu1 %625 }
 0x87e   :  { %v628_v25 = vmul.f32 %v3630_v23, %v626_v24 }
 0x880   :  { %630 = vrot.lane.b32.xlu0 %v628_v25, %s3843_s0 }
 0x8f2   :  { %v631_v28 = vpop.permute.xlu0 %630 }
 0x8f3   :  { %v633_v29 = vadd.f32 %v631_v28, %v623_v26 }
 0x8f5   :  { %3631 = vtanh.f32 %v633_v29 }
 0x8f6   :  { %3633 = vpow2.f32 %v2896_v31 }
 0x8ff   :  { %v3632_v30 = vpop.eup %3631 }
 0x900   :  { %636 = vrot.lane.b32.xlu1 %v3632_v30, %s3843_s0  ;;  %v3634_v32 = vpop.eup %3633 }
 0x901   :  { %v617_v35 = vadd.f32 1.0, %v3634_v32 }
 0x903   :  { %3635 = vrcp.f32 %v617_v35 }
 0x90d   :  { %v3636_v36 = vpop.eup %3635 }
 0x972   :  { %v637_v37 = vpop.permute.xlu1 %636 }
 0x973   :  { %v4022_v38 = vmul.f32 %v3636_v36, %v637_v37 }
 0x975   :  { %2897 = vmatmul.mubr.msk.f32.vlgmr.msra.gmra.mrb[8].mxu0 %vm62_vm0, %v4022_v38 }
 0x976   :  { %3226 = vmatpush1.bf16.msra.mxu0 %v3881_v33  ;;  %813 = vmatprep.mubr.f32.mxu0 %v3842_v0 }
 0x977   :  { %3228 = vmatprep.subr.bf16.mxu0 %v3884_v34 }
 0x97a   :  { %3230 = vmatpush1.bf16.msra.mxu0 %v3892_v40 }
 0x97b   :  { %3232 = vmatprep.subr.bf16.mxu0 %v3895_v41 }
 0x97e   :  { %3234 = vmatpush1.bf16.msra.mxu0 %v3903_v47 }
 0x97f   :  { %3236 = vmatprep.subr.bf16.mxu0 %v3906_v48 }
 0x982   :  { %3238 = vmatpush1.bf16.msra.mxu0 %v3914_v52 }
 0x983   :  { %3240 = vmatprep.subr.bf16.mxu0 %v3876_v27 }
 0xa48   :  { %v709_v39 = vpop.f32.mrb[8].mxu0 }
 0xa49   :  { %v711_v42 = vpop.f32.mrb[9].mxu0  ;;  %v3501_v45 = vadd.f32 %v709_v39, %v3963_v4 }
 0xa4a   :  { %v3502_v43 = vadd.f32 %v711_v42, %v3956_v61 }
 0xa4b   :  { %v2898_v46 = vmul.f32 -1.442695, %v3501_v45 }
 0xa4c   :  { %3637 = vtanh.f32 %v3502_v43  ;;  %v2899_v63 = vmul.f32 -1.442695, %v3502_v43 }
 0xa4d   :  { %3639 = vpow2.f32 %v2898_v46 }
 0xa56   :  { %v3638_v44 = vpop.eup %3637 }
 0xa57   :  { %731 = vrot.lane.b32.xlu0 %v3638_v44, %s3843_s0  ;;  %v3640_v50 = vpop.eup %3639 }
 0xa58   :  { %v722_v51 = vadd.f32 1.0, %v3640_v50 }
 0xa5a   :  { %3641 = vrcp.f32 %v722_v51 }
 0xa64   :  { %v3642_v53 = vpop.eup %3641 }
 0xa65   :  { %v729_v56 = vmul.f32 %v3642_v53, %v633_v29 }
 0xac9   :  { %v732_v54 = vpop.permute.xlu0 %731 }
 0xaca   :  { %v734_v55 = vmul.f32 %v3642_v53, %v732_v54 }
 0xacc   :  { %736 = vrot.lane.b32.xlu1 %v734_v55, %s3843_s0 }
 0xb3e   :  { %v737_v57 = vpop.permute.xlu1 %736 }
 0xb3f   :  { %v739_v60 = vadd.f32 %v737_v57, %v729_v56 }
 0xb41   :  { %3643 = vtanh.f32 %v739_v60 }
 0xb42   :  { %3645 = vpow2.f32 %v2899_v63 }
 0xb4b   :  { %v3644_v62 = vpop.eup %3643 }
 0xb4c   :  { %742 = vrot.lane.b32.xlu0 %v3644_v62, %s3843_s0  ;;  %v3646_v1 = vpop.eup %3645 }
 0xb4d   :  { %v723_v2 = vadd.f32 1.0, %v3646_v1 }
 0xb4f   :  { %3647 = vrcp.f32 %v723_v2 }
 0xb59   :  { %v3648_v5 = vpop.eup %3647 }
 0xbbe   :  { %v743_v6 = vpop.permute.xlu0 %742 }
 0xbbf   :  { %v4040_v7 = vmul.f32 %v3648_v5, %v743_v6 }
 0xbc1   :  { %2900 = vmatmul.mubr.msk.f32.vlgmr.msra.gmra.mrb[10].mxu0 %vm62_vm0, %v4040_v7 }
 0xbc2   :  { %3242 = vmatpush1.bf16.msra.mxu0 %v3881_v33  ;;  %919 = vmatprep.mubr.f32.mxu0 %v3842_v0 }
 0xbc3   :  { %3244 = vmatprep.subr.bf16.mxu0 %v3884_v34 }
 0xbc6   :  { %3246 = vmatpush1.bf16.msra.mxu0 %v3892_v40 }
 0xbc7   :  { %3248 = vmatprep.subr.bf16.mxu0 %v3895_v41 }
 0xbca   :  { %3250 = vmatpush1.bf16.msra.mxu0 %v3903_v47 }
 0xbcb   :  { %3252 = vmatprep.subr.bf16.mxu0 %v3906_v48 }
 0xbce   :  { %3254 = vmatpush1.bf16.msra.mxu0 %v3914_v52 }
 0xbcf   :  { %3256 = vmatprep.subr.bf16.mxu0 %v3876_v27 }
 0xc94   :  { %v815_v8 = vpop.f32.mrb[10].mxu0 }
 0xc95   :  { %v817_v9 = vpop.f32.mrb[11].mxu0  ;;  %v3503_v12 = vadd.f32 %v815_v8, %v3963_v4  ;;  %v1081_v8 = vld [vmem:[#allocation2 + $0x198] sm:$0xff] }
 0xc96   :  { %v3504_v10 = vadd.f32 %v817_v9, %v3956_v61  ;;  %v1083_v9 = vld [vmem:[#allocation2 + $0x1a8] sm:$0xff] }
 0xc97   :  { %v2901_v14 = vmul.f32 -1.442695, %v3503_v12  ;;  %v1085_v12 = vld [vmem:[#allocation2 + $0x1b8] sm:$0xff] }
 0xc98   :  { %3649 = vtanh.f32 %v3504_v10  ;;  %v2902_v24 = vmul.f32 -1.442695, %v3504_v10  ;;  %v1080_v10 = vld [vmem:[#allocation2 + $0x190] sm:$0xff] }
 0xc99   :  { %3651 = vpow2.f32 %v2901_v14  ;;  %v1087_v14 = vld [vmem:[#allocation2 + $0x1c8] sm:$0xff] }
 0xca2   :  { %v3650_v11 = vpop.eup %3649 }
 0xca3   :  { %837 = vrot.lane.b32.xlu1 %v3650_v11, %s3843_s0  ;;  %v3652_v15 = vpop.eup %3651  ;;  %v1082_v11 = vld [vmem:[#allocation2 + $0x1a0] sm:$0xff] }
 0xca4   :  { %v828_v16 = vadd.f32 1.0, %v3652_v15  ;;  %v3273_v15 = vpack.c.bf16 %v1082_v11, %v1080_v10  ;;  %v1076_v10 = vld [vmem:[#allocation2 + $0x170] sm:$0xff]  ;;  %v1355_v11 = vld [vmem:[#allocation2 + $0x218] sm:$0xff] }
 0xca6   :  { %3653 = vrcp.f32 %v828_v16  ;;  %v3275_v16 = vpack.c.bf16 %v1087_v14, %v1085_v12  ;;  %v1357_v12 = vld [vmem:[#allocation2 + $0x228] sm:$0xff] }
 0xcb0   :  { %v3654_v17 = vpop.eup %3653 }
 0xcb1   :  { %v835_v27 = vmul.f32 %v3654_v17, %v739_v60 }
 0xd15   :  { %v838_v18 = vpop.permute.xlu1 %837 }
 0xd16   :  { %v840_v19 = vmul.f32 %v3654_v17, %v838_v18  ;;  %v1086_v17 = vld [vmem:[#allocation2 + $0x1c0] sm:$0xff]  ;;  %v1089_v18 = vld [vmem:[#allocation2 + $0x1d8] sm:$0xff] }
 0xd18   :  { %842 = vrot.lane.b32.xlu0 %v840_v19, %s3843_s0  ;;  %v1091_v19 = vld [vmem:[#allocation2 + $0x1e8] sm:$0xff] }
 0xd8a   :  { %v843_v20 = vpop.permute.xlu0 %842 }
 0xd8b   :  { %v845_v22 = vadd.f32 %v843_v20, %v835_v27  ;;  %v3279_v20 = vpack.c.bf16 %v1091_v19, %v1089_v18  ;;  %v1361_v18 = vld [vmem:[#allocation2 + $0x248] sm:$0xff] }
 0xd8d   :  { %3655 = vtanh.f32 %v845_v22 }
 0xd8e   :  { %3657 = vpow2.f32 %v2902_v24  ;;  %v1093_v24 = vld [vmem:[#allocation2 + $0x1f8] sm:$0xff] }
 0xd97   :  { %v3656_v23 = vpop.eup %3655 }
 0xd98   :  { %848 = vrot.lane.b32.xlu1 %v3656_v23, %s3843_s0  ;;  %v3658_v25 = vpop.eup %3657  ;;  %v1090_v23 = vld [vmem:[#allocation2 + $0x1e0] sm:$0xff] }
 0xd99   :  { %v829_v26 = vadd.f32 1.0, %v3658_v25  ;;  %v1095_v25 = vld [vmem:[#allocation2 + $0x208] sm:$0xff] }
 0xd9b   :  { %3659 = vrcp.f32 %v829_v26 }
 0xda5   :  { %v3660_v28 = vpop.eup %3659 }
 0xe0a   :  { %v849_v29 = vpop.permute.xlu1 %848 }
 0xe0b   :  { %v4058_v30 = vmul.f32 %v3660_v28, %v849_v29  ;;  %v3283_v28 = vpack.c.bf16 %v1095_v25, %v1093_v24  ;;  %v1092_v29 = vld [vmem:[#allocation2 + $0x1f0] sm:$0xff]  ;;  %v1365_v24 = vld [vmem:[#allocation2 + $0x268] sm:$0xff] }
 0xe0d   :  { %2903 = vmatmul.mubr.msk.f32.vlgmr.msra.gmra.mrb[12].mxu0 %vm62_vm0, %v4058_v30 }
 0xe0e   :  { %3258 = vmatpush1.bf16.msra.mxu0 %v3881_v33  ;;  %1025 = vmatprep.mubr.f32.mxu0 %v3842_v0 }
 0xe0f   :  { %3260 = vmatprep.subr.bf16.mxu0 %v3884_v34 }
 0xe12   :  { %3262 = vmatpush1.bf16.msra.mxu0 %v3892_v40 }
 0xe13   :  { %3264 = vmatprep.subr.bf16.mxu0 %v3895_v41 }
 0xe16   :  { %3266 = vmatpush1.bf16.msra.mxu0 %v3903_v47 }
 0xe17   :  { %3268 = vmatprep.subr.bf16.mxu0 %v3906_v48 }
 0xe1a   :  { %3270 = vmatpush1.bf16.msra.mxu0 %v3914_v52 }
 0xee0   :  { %v921_v31 = vpop.f32.mrb[12].mxu0 }
 0xee1   :  { %v923_v32 = vpop.f32.mrb[13].mxu0  ;;  %v3505_v34 = vadd.f32 %v921_v31, %v3963_v4  ;;  %v1094_v31 = vld [vmem:[#allocation2 + $0x200] sm:$0xff] }
 0xee2   :  { %v3506_v35 = vadd.f32 %v923_v32, %v3956_v61  ;;  %v3285_v32 = vpack.c.bf16 %v1094_v31, %v1092_v29  ;;  %v1364_v29 = vld [vmem:[#allocation2 + $0x260] sm:$0xff]  ;;  %v1367_v31 = vld [vmem:[#allocation2 + $0x278] sm:$0xff] }
 0xee3   :  { %v2904_v36 = vmul.f32 -1.442695, %v3505_v34 }
 0xee4   :  { %3661 = vtanh.f32 %v3506_v35  ;;  %v2905_v44 = vmul.f32 -1.442695, %v3506_v35 }
 0xee5   :  { %3663 = vpow2.f32 %v2904_v36  ;;  %v1065_v36 = vld [vmem:[#allocation2 + $0x118] sm:$0xff] }
 0xeee   :  { %v3662_v33 = vpop.eup %3661 }
 0xeef   :  { %943 = vrot.lane.b32.xlu0 %v3662_v33, %s3843_s0  ;;  %v3664_v40 = vpop.eup %3663 }
 0xef0   :  { %v934_v41 = vadd.f32 1.0, %v3664_v40  ;;  %v1067_v40 = vld [vmem:[#allocation2 + $0x128] sm:$0xff] }
 0xef2   :  { %3665 = vrcp.f32 %v934_v41  ;;  %v3287_v41 = vpack.c.bf16 %v1067_v40, %v1065_v36 }
 0xefc   :  { %v3666_v47 = vpop.eup %3665 }
 0xefd   :  { %v941_v52 = vmul.f32 %v3666_v47, %v845_v22  ;;  %v1088_v22 = vld [vmem:[#allocation2 + $0x1d0] sm:$0xff] }
 0xefe   :  { %v3281_v26 = vpack.c.bf16 %v1090_v23, %v1088_v22  ;;  %v1360_v22 = vld [vmem:[#allocation2 + $0x240] sm:$0xff]  ;;  %v1363_v23 = vld [vmem:[#allocation2 + $0x258] sm:$0xff] }
 0xf61   :  { %v944_v37 = vpop.permute.xlu0 %943 }
 0xf62   :  { %v946_v48 = vmul.f32 %v3666_v47, %v944_v37 }
 0xf64   :  { %948 = vrot.lane.b32.xlu1 %v946_v48, %s3843_s0 }
 0xfd6   :  { %v949_v39 = vpop.permute.xlu1 %948 }
 0xfd7   :  { %v951_v42 = vadd.f32 %v949_v39, %v941_v52  ;;  %v1064_v39 = vld [vmem:[#allocation2 + $0x110] sm:$0xff] }
 0xfd9   :  { %3667 = vtanh.f32 %v951_v42 }
 0xfda   :  { %3669 = vpow2.f32 %v2905_v44  ;;  %v1069_v44 = vld [vmem:[#allocation2 + $0x138] sm:$0xff] }
 0xfe3   :  { %v3668_v43 = vpop.eup %3667 }
 0xfe4   :  { %954 = vrot.lane.b32.xlu0 %v3668_v43, %s3843_s0  ;;  %v3670_v45 = vpop.eup %3669  ;;  %v1066_v43 = vld [vmem:[#allocation2 + $0x120] sm:$0xff] }
 0xfe5   :  { %v935_v46 = vadd.f32 1.0, %v3670_v45  ;;  %v1071_v45 = vld [vmem:[#allocation2 + $0x148] sm:$0xff] }
 0xfe7   :  { %3671 = vrcp.f32 %v935_v46 }
 0xff1   :  { %v3672_v50 = vpop.eup %3671 }
0x1056   :  { %v955_v51 = vpop.permute.xlu0 %954 }
0x1057   :  { %v4075_v53 = vmul.f32 %v3672_v50, %v955_v51  ;;  %v3289_v50 = vpack.c.bf16 %v1066_v43, %v1064_v39 }
0x1059   :  { %2906 = vmatmul.mubr.msk.f32.vlgmr.msra.gmra.mrb[14].mxu0 %vm62_vm0, %v4075_v53 }
0x112c   :  { %v1027_v54 = vpop.f32.mrb[14].mxu0 }
0x112d   :  { %v1029_v55 = vpop.f32.mrb[15].mxu0  ;;  %v3507_v60 = vadd.f32 %v1027_v54, %v3963_v4  ;;  %v1084_v4 = vld [vmem:[#allocation2 + $0x1b0] sm:$0xff]  ;;  %v3291_v54 = vpack.c.bf16 %v1071_v45, %v1069_v44 }
0x112e   :  { %v3508_v56 = vadd.f32 %v1029_v55, %v3956_v61  ;;  %v3271_v61 = vpack.c.bf16 %v1083_v9, %v1081_v8  ;;  %v3277_v27 = vpack.c.bf16 %v1086_v17, %v1084_v4  ;;  %v1068_v55 = vld [vmem:[#allocation2 + $0x130] sm:$0xff]  ;;  %v1356_v4 = vld [vmem:[#allocation2 + $0x220] sm:$0xff]  ;;  %v1359_v17 = vld [vmem:[#allocation2 + $0x238] sm:$0xff] }
0x112f   :  { %v2907_v62 = vmul.f32 -1.442695, %v3507_v60  ;;  %v1073_v60 = vld [vmem:[#allocation2 + $0x158] sm:$0xff] }
0x1130   :  { %3673 = vtanh.f32 %v3508_v56  ;;  %3272 = vmatprep.subr.bf16.mxu1 %v3271_v61  ;;  %v2908_v37 = vmul.f32 -1.442695, %v3508_v56  ;;  %v1078_v61 = vld [vmem:[#allocation2 + $0x180] sm:$0xff] }
0x1131   :  { %3675 = vpow2.f32 %v2907_v62  ;;  %3274 = vmatpush1.bf16.msra.mxu1 %v3273_v15  ;;  %v1075_v62 = vld [vmem:[#allocation2 + $0x168] sm:$0xff]  ;;  %v3301_v14 = vpack.c.bf16 %v1078_v61, %v1076_v10  ;;  %v4095_v15 = vpack.c.bf16 %v1357_v12, %v1355_v11 }
0x1132   :  { %3276 = vmatprep.subr.bf16.mxu1 %v3275_v16  ;;  %v1354_v16 = vld [vmem:[#allocation2 + $0x210] sm:$0xff] }
0x1133   :  { %v4113_v19 = vpack.c.bf16 %v1356_v4, %v1354_v16 }
0x1135   :  { %3278 = vmatpush1.bf16.msra.mxu1 %v3277_v27  ;;  %v4115_v27 = vpack.c.bf16 %v1361_v18, %v1359_v17 }
0x1136   :  { %3280 = vmatprep.subr.bf16.mxu1 %v3279_v20  ;;  %v1358_v20 = vld [vmem:[#allocation2 + $0x230] sm:$0xff] }
0x1137   :  { %v4121_v25 = vpack.c.bf16 %v1360_v22, %v1358_v20 }
0x1139   :  { %3282 = vmatpush1.bf16.msra.mxu1 %v3281_v26  ;;  %v4124_v26 = vpack.c.bf16 %v1365_v24, %v1363_v23 }
0x113a   :  { %v3674_v57 = vpop.eup %3673  ;;  %3284 = vmatprep.subr.bf16.mxu1 %v3283_v28  ;;  %v1362_v28 = vld [vmem:[#allocation2 + $0x250] sm:$0xff] }
0x113b   :  { %1049 = vrot.lane.b32.xlu1 %v3674_v57, %s3843_s0  ;;  %v3676_v63 = vpop.eup %3675  ;;  %v1070_v57 = vld [vmem:[#allocation2 + $0x140] sm:$0xff] }
0x113c   :  { %v1040_v1 = vadd.f32 1.0, %v3676_v63  ;;  %v3293_v56 = vpack.c.bf16 %v1070_v57, %v1068_v55  ;;  %v3295_v63 = vpack.c.bf16 %v1075_v62, %v1073_v60 }
0x113d   :  { %3286 = vmatpush1.bf16.msra.mxu1 %v3285_v32  ;;  %v1369_v32 = vld [vmem:[#allocation2 + $0x288] sm:$0xff] }
0x113e   :  { %3677 = vrcp.f32 %v1040_v1  ;;  %3288 = vmatprep.subr.bf16.mxu1 %v3287_v41  ;;  %v1072_v1 = vld [vmem:[#allocation2 + $0x150] sm:$0xff] }
0x1148   :  { %v3678_v2 = vpop.eup %3677 }
0x1149   :  { %v1047_v35 = vmul.f32 %v3678_v2, %v951_v42 }
0x11ad   :  { %v1050_v5 = vpop.permute.xlu1 %1049 }
0x11ae   :  { %v1052_v6 = vmul.f32 %v3678_v2, %v1050_v5  ;;  %v1074_v2 = vld [vmem:[#allocation2 + $0x160] sm:$0xff]  ;;  %v1077_v5 = vld [vmem:[#allocation2 + $0x178] sm:$0xff] }
0x11af   :  { %v3297_v8 = vpack.c.bf16 %v1074_v2, %v1072_v1 }
0x11b0   :  { %1054 = vrot.lane.b32.xlu0 %v1052_v6, %s3843_s0  ;;  %v1079_v6 = vld [vmem:[#allocation2 + $0x188] sm:$0xff] }
0x11b1   :  { %v3299_v9 = vpack.c.bf16 %v1079_v6, %v1077_v5 }
0x1222   :  { %v1055_v33 = vpop.permute.xlu0 %1054 }
0x1223   :  { %v1057_v34 = vadd.f32 %v1055_v33, %v1047_v35  ;;  %v4133_v35 = vpack.c.bf16 %v1369_v32, %v1367_v31  ;;  %v1366_v33 = vld [vmem:[#allocation2 + $0x270] sm:$0xff] }
0x1225   :  { %3679 = vtanh.f32 %v1057_v34  ;;  %v1368_v34 = vld [vmem:[#allocation2 + $0x280] sm:$0xff] }
0x1226   :  { %3681 = vpow2.f32 %v2908_v37 }
0x122f   :  { %v3680_v47 = vpop.eup %3679 }
0x1230   :  { %1060 = vrot.lane.b32.xlu1 %v3680_v47, %s3843_s0  ;;  %v3682_v48 = vpop.eup %3681 }
0x1231   :  { %v1041_v52 = vadd.f32 1.0, %v3682_v48 }
0x1233   :  { %3683 = vrcp.f32 %v1041_v52 }
0x123d   :  { %v3684_v42 = vpop.eup %3683 }
0x12a2   :  { %v1061_v46 = vpop.permute.xlu1 %1060 }
0x12a3   :  { %v4084_v51 = vmul.f32 %v3684_v42, %v1061_v46 }
0x12a5   :  { %2909 = vmatmul.mubr.msk.f32.vlgmr.msra.gmra.mrb[0].mxu1 %vm62_vm0, %v4084_v51 }
0x12a6   :  { %3290 = vmatpush1.bf16.msra.mxu1 %v3289_v50  ;;  %1169 = vmatprep.mubr.f32.mxu1 %v3842_v0 }
0x12a7   :  { %3292 = vmatprep.subr.bf16.mxu1 %v3291_v54 }
0x12a9   :  { %2910 = vmatmul.mubr.msk.f32.gmra.mrb[2].mxu1 %vm62_vm0, %v4075_v53 }
0x12aa   :  { %1175 = vmatprep.mubr.f32.mxu1 %v3842_v0  ;;  %3294 = vmatpush1.bf16.msra.mxu1 %v3293_v56 }
0x12ab   :  { %3296 = vmatprep.subr.bf16.mxu1 %v3295_v63 }
0x12ad   :  { %2911 = vmatmul.mubr.msk.f32.gmra.mrb[4].mxu1 %vm62_vm0, %v4058_v30 }
0x12ae   :  { %1181 = vmatprep.mubr.f32.mxu1 %v3842_v0  ;;  %3298 = vmatpush1.bf16.msra.mxu1 %v3297_v8 }
0x12af   :  { %3300 = vmatprep.subr.bf16.mxu1 %v3299_v9 }
0x12b1   :  { %2912 = vmatmul.mubr.msk.f32.gmra.mrb[6].mxu1 %vm62_vm0, %v4040_v7 }
0x12b2   :  { %1187 = vmatprep.mubr.f32.mxu1 %v3842_v0  ;;  %3302 = vmatpush1.bf16.msra.mxu1 %v3301_v14 }
0x12b3   :  { %3304 = vmatprep.subr.bf16.mxu1 %v4095_v15 }
0x12b5   :  { %2913 = vmatmul.mubr.msk.f32.gmra.mrb[8].mxu1 %vm62_vm0, %v4022_v38 }
0x12b6   :  { %1193 = vmatprep.mubr.f32.mxu1 %v3842_v0 }
0x12b9   :  { %2914 = vmatmul.mubr.msk.f32.gmra.mrb[10].mxu1 %vm62_vm0, %v4004_v13 }
0x12ba   :  { %1199 = vmatprep.mubr.f32.mxu1 %v3842_v0 }
0x12bd   :  { %2915 = vmatmul.mubr.msk.f32.gmra.mrb[12].mxu1 %vm62_vm0, %v3986_v49 }
0x12be   :  { %1205 = vmatprep.mubr.f32.mxu1 %v3842_v0 }
0x12c1   :  { %2916 = vmatmul.mubr.msk.f32.gmra.mrb[14].mxu1 %vm62_vm0, %v3968_v21 }
0x12c2   :  { %1276 = vmatprep.mubr.f32.mxu1 %v3842_v0 }
0x12c5   :  { %2917 = vmatmul.mubr.msk.f32.vlgmr.msra.gmra.mrb[0].mxu1 %vm62_vm0, %v3968_v21  ;;  %v4130_v21 = vpack.c.bf16 %v1364_v29, %v1362_v28 }
0x12c6   :  { %3306 = vmatpush1.bf16.msra.mxu1 %v4113_v19  ;;  %1282 = vmatprep.mubr.f32.mxu1 %v3842_v0 }
0x12c7   :  { %3308 = vmatprep.subr.bf16.mxu1 %v4115_v27 }
0x12c9   :  { %2918 = vmatmul.mubr.msk.f32.gmra.mrb[2].mxu1 %vm62_vm0, %v3986_v49  ;;  %v4139_v49 = vpack.c.bf16 %v1368_v34, %v1366_v33 }
0x12ca   :  { %1288 = vmatprep.mubr.f32.mxu1 %v3842_v0  ;;  %3310 = vmatpush1.bf16.msra.mxu1 %v4121_v25 }
0x12cb   :  { %3312 = vmatprep.subr.bf16.mxu1 %v4124_v26 }
0x12cd   :  { %2919 = vmatmul.mubr.msk.f32.gmra.mrb[4].mxu1 %vm62_vm0, %v4004_v13  ;;  %v1326_v13 = vld [vmem:[#allocation2 + $0x290] ss:$8 sm:$0x3] }
0x12ce   :  { %1294 = vmatprep.mubr.f32.mxu1 %v3842_v0  ;;  %3314 = vmatpush1.bf16.msra.mxu1 %v4130_v21  ;;  %v4177_v40 = vrot.slane %v1326_v13, %v54_v3 }
0x12cf   :  { %3316 = vmatprep.subr.bf16.mxu1 %v4133_v35 }
0x12d1   :  { %2920 = vmatmul.mubr.msk.f32.gmra.mrb[6].mxu1 %vm62_vm0, %v4022_v38  ;;  %v4171_v38 = vrot.slane %v1326_v13, %v58_v59 }
0x12d2   :  { %1300 = vmatprep.mubr.f32.mxu1 %v3842_v0  ;;  %3318 = vmatpush1.bf16.msra.mxu1 %v4139_v49 }
0x12d3   :  { %3320 = vmatprep.subr.bf16.mxu1 %v4095_v15 }
0x12d5   :  { %2921 = vmatmul.mubr.msk.f32.gmra.mrb[8].mxu1 %vm62_vm0, %v4040_v7 }
0x12d6   :  { %1306 = vmatprep.mubr.f32.mxu1 %v3842_v0 }
0x12d9   :  { %2922 = vmatmul.mubr.msk.f32.gmra.mrb[10].mxu1 %vm62_vm0, %v4058_v30 }
0x12da   :  { %1312 = vmatprep.mubr.f32.mxu1 %v3842_v0 }
0x12dd   :  { %2923 = vmatmul.mubr.msk.f32.gmra.mrb[12].mxu1 %vm62_vm0, %v4075_v53 }
0x12de   :  { %1318 = vmatprep.mubr.f32.mxu1 %v3842_v0 }
0x12e1   :  { %2924 = vmatmul.mubr.msk.f32.gmra.mrb[14].mxu1 %vm62_vm0, %v4084_v51 }
0x12e2   :  { %1434 = vmatprep.mubr.f32.mxu1 %v3842_v0 }
0x12e5   :  { %1435 = vmatmul.mubr.f32.vlgmr.msra.gmra.mrb[0].mxu1 %v3842_v0 }
0x12e6   :  { %3322 = vmatpush1.bf16.msra.mxu1 %v4113_v19  ;;  %1540 = vmatprep.mubr.f32.mxu1 %v3842_v0 }
0x12e7   :  { %3324 = vmatprep.subr.bf16.mxu1 %v4115_v27 }
0x12ea   :  { %3326 = vmatpush1.bf16.msra.mxu1 %v4121_v25 }
0x12eb   :  { %3328 = vmatprep.subr.bf16.mxu1 %v4124_v26 }
0x12ee   :  { %3330 = vmatpush1.bf16.msra.mxu1 %v4130_v21 }
0x12ef   :  { %3332 = vmatprep.subr.bf16.mxu1 %v4133_v35 }
0x12f2   :  { %3334 = vmatpush1.bf16.msra.mxu1 %v4139_v49 }
0x12f3   :  { %3336 = vmatprep.subr.bf16.mxu1 %v4095_v15 }
0x13b8   :  { %v1436_v7 = vpop.f32.mrb[0].mxu1 }
0x13b9   :  { %v1438_v30 = vpop.f32.mrb[1].mxu1  ;;  %v3509_v41 = vadd.f32 %v1436_v7, %v4177_v40 }
0x13ba   :  { %v3510_v53 = vadd.f32 %v1438_v30, %v4171_v38 }
0x13bb   :  { %v2925_v47 = vmul.f32 -1.442695, %v3509_v41 }
0x13bc   :  { %3685 = vtanh.f32 %v3510_v53  ;;  %v2926_v58 = vmul.f32 -1.442695, %v3510_v53 }
0x13bd   :  { %3687 = vpow2.f32 %v2925_v47 }
0x13c6   :  { %v3686_v36 = vpop.eup %3685 }
0x13c7   :  { %1458 = vrot.lane.b32.xlu0 %v3686_v36, %s3843_s0  ;;  %v3688_v37 = vpop.eup %3687 }
0x13c8   :  { %v1449_v48 = vadd.f32 1.0, %v3688_v37 }
0x13ca   :  { %3689 = vrcp.f32 %v1449_v48 }
0x13d4   :  { %v3690_v59 = vpop.eup %3689 }
0x13d5   :  { %v1456_v43 = vmul.f32 0.0, %v3690_v59 }
0x1439   :  { %v1459_v52 = vpop.permute.xlu0 %1458 }
0x143a   :  { %v1461_v39 = vmul.f32 %v3690_v59, %v1459_v52 }
0x143c   :  { %1463 = vrot.lane.b32.xlu1 %v1461_v39, %s3843_s0 }
0x14ae   :  { %v1464_v44 = vpop.permute.xlu1 %1463 }
0x14af   :  { %v1466_v45 = vadd.f32 %v1464_v44, %v1456_v43 }
0x14b1   :  { %3691 = vtanh.f32 %v1466_v45 }
0x14b2   :  { %3693 = vpow2.f32 %v2926_v58 }
0x14bb   :  { %v3692_v42 = vpop.eup %3691 }
0x14bc   :  { %1469 = vrot.lane.b32.xlu0 %v3692_v42, %s3843_s0  ;;  %v3694_v3 = vpop.eup %3693 }
0x14bd   :  { %v1450_v46 = vadd.f32 1.0, %v3694_v3 }
0x14bf   :  { %3695 = vrcp.f32 %v1450_v46 }
0x14c9   :  { %v3696_v50 = vpop.eup %3695 }
0x152e   :  { %v1470_v51 = vpop.permute.xlu0 %1469 }
0x152f   :  { %v4182_v54 = vmul.f32 %v3696_v50, %v1470_v51 }
0x1531   :  { %2927 = vmatmul.mubr.msk.f32.vlgmr.msra.gmra.mrb[2].mxu1 %vm62_vm0, %v4182_v54 }
0x1532   :  { %3338 = vmatpush1.bf16.msra.mxu1 %v4113_v19  ;;  %1646 = vmatprep.mubr.f32.mxu1 %v3842_v0 }
0x1533   :  { %3340 = vmatprep.subr.bf16.mxu1 %v4115_v27 }
0x1536   :  { %3342 = vmatpush1.bf16.msra.mxu1 %v4121_v25 }
0x1537   :  { %3344 = vmatprep.subr.bf16.mxu1 %v4124_v26 }
0x153a   :  { %3346 = vmatpush1.bf16.msra.mxu1 %v4130_v21 }
0x153b   :  { %3348 = vmatprep.subr.bf16.mxu1 %v4133_v35 }
0x153e   :  { %3350 = vmatpush1.bf16.msra.mxu1 %v4139_v49 }
0x153f   :  { %3352 = vmatprep.subr.bf16.mxu1 %v4095_v15 }
0x1604   :  { %v1542_v55 = vpop.f32.mrb[2].mxu1 }
0x1605   :  { %v1544_v57 = vpop.f32.mrb[3].mxu1  ;;  %v3511_v56 = vadd.f32 %v1542_v55, %v4177_v40 }
0x1606   :  { %v3512_v60 = vadd.f32 %v1544_v57, %v4171_v38 }
0x1607   :  { %v2928_v63 = vmul.f32 -1.442695, %v3511_v56 }
0x1608   :  { %3697 = vtanh.f32 %v3512_v60  ;;  %v2929_v12 = vmul.f32 -1.442695, %v3512_v60 }
0x1609   :  { %3699 = vpow2.f32 %v2928_v63 }
0x1612   :  { %v3698_v62 = vpop.eup %3697 }
0x1613   :  { %1564 = vrot.lane.b32.xlu1 %v3698_v62, %s3843_s0  ;;  %v3700_v1 = vpop.eup %3699 }
0x1614   :  { %v1555_v2 = vadd.f32 1.0, %v3700_v1 }
0x1616   :  { %3701 = vrcp.f32 %v1555_v2 }
0x1620   :  { %v3702_v5 = vpop.eup %3701 }
0x1621   :  { %v1562_v9 = vmul.f32 %v3702_v5, %v1466_v45 }
0x1685   :  { %v1565_v6 = vpop.permute.xlu1 %1564 }
0x1686   :  { %v1567_v8 = vmul.f32 %v3702_v5, %v1565_v6 }
0x1688   :  { %1569 = vrot.lane.b32.xlu0 %v1567_v8, %s3843_s0 }
0x16fa   :  { %v1570_v10 = vpop.permute.xlu0 %1569 }
0x16fb   :  { %v1572_v61 = vadd.f32 %v1570_v10, %v1562_v9 }
0x16fd   :  { %3703 = vtanh.f32 %v1572_v61 }
0x16fe   :  { %3705 = vpow2.f32 %v2929_v12 }
0x1707   :  { %v3704_v11 = vpop.eup %3703 }
0x1708   :  { %1575 = vrot.lane.b32.xlu1 %v3704_v11, %s3843_s0  ;;  %v3706_v14 = vpop.eup %3705 }
0x1709   :  { %v1556_v16 = vadd.f32 1.0, %v3706_v14 }
0x170b   :  { %3707 = vrcp.f32 %v1556_v16 }
0x1715   :  { %v3708_v4 = vpop.eup %3707 }
0x177a   :  { %v1576_v17 = vpop.permute.xlu1 %1575 }
0x177b   :  { %v4200_v18 = vmul.f32 %v3708_v4, %v1576_v17 }
0x177d   :  { %2930 = vmatmul.mubr.msk.f32.vlgmr.msra.gmra.mrb[4].mxu1 %vm62_vm0, %v4200_v18 }
0x177e   :  { %3354 = vmatpush1.bf16.msra.mxu1 %v4113_v19  ;;  %1752 = vmatprep.mubr.f32.mxu1 %v3842_v0 }
0x177f   :  { %3356 = vmatprep.subr.bf16.mxu1 %v4115_v27 }
0x1782   :  { %3358 = vmatpush1.bf16.msra.mxu1 %v4121_v25 }
0x1783   :  { %3360 = vmatprep.subr.bf16.mxu1 %v4124_v26 }
0x1786   :  { %3362 = vmatpush1.bf16.msra.mxu1 %v4130_v21 }
0x1787   :  { %3364 = vmatprep.subr.bf16.mxu1 %v4133_v35 }
0x178a   :  { %3366 = vmatpush1.bf16.msra.mxu1 %v4139_v49 }
0x178b   :  { %3368 = vmatprep.subr.bf16.mxu1 %v4095_v15 }
0x1850   :  { %v1648_v20 = vpop.f32.mrb[4].mxu1 }
0x1851   :  { %v1650_v22 = vpop.f32.mrb[5].mxu1  ;;  %v3513_v28 = vadd.f32 %v1648_v20, %v4177_v40 }
0x1852   :  { %v3514_v23 = vadd.f32 %v1650_v22, %v4171_v38 }
0x1853   :  { %v2931_v29 = vmul.f32 -1.442695, %v3513_v28 }
0x1854   :  { %3709 = vtanh.f32 %v3514_v23  ;;  %v2932_v41 = vmul.f32 -1.442695, %v3514_v23 }
0x1855   :  { %3711 = vpow2.f32 %v2931_v29 }
0x185e   :  { %v3710_v24 = vpop.eup %3709 }
0x185f   :  { %1670 = vrot.lane.b32.xlu0 %v3710_v24, %s3843_s0  ;;  %v3712_v31 = vpop.eup %3711 }
0x1860   :  { %v1661_v32 = vadd.f32 1.0, %v3712_v31 }
0x1862   :  { %3713 = vrcp.f32 %v1661_v32 }
0x186c   :  { %v3714_v33 = vpop.eup %3713 }
0x186d   :  { %v1668_v7 = vmul.f32 %v3714_v33, %v1572_v61 }
0x18d1   :  { %v1671_v34 = vpop.permute.xlu0 %1670 }
0x18d2   :  { %v1673_v13 = vmul.f32 %v3714_v33, %v1671_v34 }
0x18d4   :  { %1675 = vrot.lane.b32.xlu1 %v1673_v13, %s3843_s0 }
0x1946   :  { %v1676_v30 = vpop.permute.xlu1 %1675 }
0x1947   :  { %v1678_v53 = vadd.f32 %v1676_v30, %v1668_v7 }
0x1949   :  { %3715 = vtanh.f32 %v1678_v53 }
0x194a   :  { %3717 = vpow2.f32 %v2932_v41 }
0x1953   :  { %v3716_v36 = vpop.eup %3715 }
0x1954   :  { %1681 = vrot.lane.b32.xlu0 %v3716_v36, %s3843_s0  ;;  %v3718_v47 = vpop.eup %3717 }
0x1955   :  { %v1662_v37 = vadd.f32 1.0, %v3718_v47 }
0x1957   :  { %3719 = vrcp.f32 %v1662_v37 }
0x1961   :  { %v3720_v48 = vpop.eup %3719 }
0x19c6   :  { %v1682_v59 = vpop.permute.xlu0 %1681 }
0x19c7   :  { %v4218_v52 = vmul.f32 %v3720_v48, %v1682_v59 }
0x19c9   :  { %2933 = vmatmul.mubr.msk.f32.vlgmr.msra.gmra.mrb[6].mxu1 %vm62_vm0, %v4218_v52 }
0x19ca   :  { %3370 = vmatpush1.bf16.msra.mxu1 %v4113_v19  ;;  %1858 = vmatprep.mubr.f32.mxu1 %v3842_v0 }
0x19cb   :  { %3372 = vmatprep.subr.bf16.mxu1 %v4115_v27 }
0x19ce   :  { %3374 = vmatpush1.bf16.msra.mxu1 %v4121_v25 }
0x19cf   :  { %3376 = vmatprep.subr.bf16.mxu1 %v4124_v26 }
0x19d2   :  { %3378 = vmatpush1.bf16.msra.mxu1 %v4130_v21 }
0x19d3   :  { %3380 = vmatprep.subr.bf16.mxu1 %v4133_v35 }
0x19d6   :  { %3382 = vmatpush1.bf16.msra.mxu1 %v4139_v49 }
0x19d7   :  { %3384 = vmatprep.subr.bf16.mxu1 %v4095_v15 }
0x1a9c   :  { %v1754_v39 = vpop.f32.mrb[6].mxu1 }
0x1a9d   :  { %v1756_v43 = vpop.f32.mrb[7].mxu1  ;;  %v3515_v42 = vadd.f32 %v1754_v39, %v4177_v40 }
0x1a9e   :  { %v3516_v44 = vadd.f32 %v1756_v43, %v4171_v38 }
0x1a9f   :  { %v2934_v58 = vmul.f32 -1.442695, %v3515_v42 }
0x1aa0   :  { %3721 = vtanh.f32 %v3516_v44  ;;  %v2935_v63 = vmul.f32 -1.442695, %v3516_v44 }
0x1aa1   :  { %3723 = vpow2.f32 %v2934_v58 }
0x1aaa   :  { %v3722_v45 = vpop.eup %3721 }
0x1aab   :  { %1776 = vrot.lane.b32.xlu1 %v3722_v45, %s3843_s0  ;;  %v3724_v3 = vpop.eup %3723 }
0x1aac   :  { %v1767_v46 = vadd.f32 1.0, %v3724_v3 }
0x1aae   :  { %3725 = vrcp.f32 %v1767_v46 }
0x1ab8   :  { %v3726_v50 = vpop.eup %3725 }
0x1ab9   :  { %v1774_v57 = vmul.f32 %v3726_v50, %v1678_v53 }
0x1b1d   :  { %v1777_v51 = vpop.permute.xlu1 %1776 }
0x1b1e   :  { %v1779_v55 = vmul.f32 %v3726_v50, %v1777_v51 }
0x1b20   :  { %1781 = vrot.lane.b32.xlu0 %v1779_v55, %s3843_s0 }
0x1b92   :  { %v1782_v60 = vpop.permute.xlu0 %1781 }
0x1b93   :  { %v1784_v62 = vadd.f32 %v1782_v60, %v1774_v57 }
0x1b95   :  { %3727 = vtanh.f32 %v1784_v62 }
0x1b96   :  { %3729 = vpow2.f32 %v2935_v63 }
0x1b9f   :  { %v3728_v56 = vpop.eup %3727 }
0x1ba0   :  { %1787 = vrot.lane.b32.xlu1 %v3728_v56, %s3843_s0  ;;  %v3730_v1 = vpop.eup %3729 }
0x1ba1   :  { %v1768_v2 = vadd.f32 1.0, %v3730_v1 }
0x1ba3   :  { %3731 = vrcp.f32 %v1768_v2 }
0x1bad   :  { %v3732_v5 = vpop.eup %3731 }
0x1c12   :  { %v1788_v6 = vpop.permute.xlu1 %1787 }
0x1c13   :  { %v4236_v8 = vmul.f32 %v3732_v5, %v1788_v6 }
0x1c15   :  { %2936 = vmatmul.mubr.msk.f32.vlgmr.msra.gmra.mrb[8].mxu1 %vm62_vm0, %v4236_v8 }
0x1c16   :  { %3386 = vmatpush1.bf16.msra.mxu1 %v4113_v19  ;;  %1964 = vmatprep.mubr.f32.mxu1 %v3842_v0 }
0x1c17   :  { %3388 = vmatprep.subr.bf16.mxu1 %v4115_v27 }
0x1c1a   :  { %3390 = vmatpush1.bf16.msra.mxu1 %v4121_v25 }
0x1c1b   :  { %3392 = vmatprep.subr.bf16.mxu1 %v4124_v26 }
0x1c1e   :  { %3394 = vmatpush1.bf16.msra.mxu1 %v4130_v21 }
0x1c1f   :  { %3396 = vmatprep.subr.bf16.mxu1 %v4133_v35 }
0x1c22   :  { %3398 = vmatpush1.bf16.msra.mxu1 %v4139_v49 }
0x1c23   :  { %3400 = vmatprep.subr.bf16.mxu1 %v4095_v15 }
0x1ce8   :  { %v1860_v9 = vpop.f32.mrb[8].mxu1 }
0x1ce9   :  { %v1862_v10 = vpop.f32.mrb[9].mxu1  ;;  %v3517_v12 = vadd.f32 %v1860_v9, %v4177_v40 }
0x1cea   :  { %v3518_v61 = vadd.f32 %v1862_v10, %v4171_v38 }
0x1ceb   :  { %v2937_v14 = vmul.f32 -1.442695, %v3517_v12 }
0x1cec   :  { %3733 = vtanh.f32 %v3518_v61  ;;  %v2938_v31 = vmul.f32 -1.442695, %v3518_v61 }
0x1ced   :  { %3735 = vpow2.f32 %v2937_v14 }
0x1cf6   :  { %v3734_v11 = vpop.eup %3733 }
0x1cf7   :  { %1882 = vrot.lane.b32.xlu0 %v3734_v11, %s3843_s0  ;;  %v3736_v16 = vpop.eup %3735 }
0x1cf8   :  { %v1873_v4 = vadd.f32 1.0, %v3736_v16 }
0x1cfa   :  { %3737 = vrcp.f32 %v1873_v4 }
0x1d04   :  { %v3738_v17 = vpop.eup %3737 }
0x1d05   :  { %v1880_v23 = vmul.f32 %v3738_v17, %v1784_v62 }
0x1d69   :  { %v1883_v20 = vpop.permute.xlu0 %1882 }
0x1d6a   :  { %v1885_v22 = vmul.f32 %v3738_v17, %v1883_v20 }
0x1d6c   :  { %1887 = vrot.lane.b32.xlu1 %v1885_v22, %s3843_s0 }
0x1dde   :  { %v1888_v24 = vpop.permute.xlu1 %1887 }
0x1ddf   :  { %v1890_v28 = vadd.f32 %v1888_v24, %v1880_v23 }
0x1de1   :  { %3739 = vtanh.f32 %v1890_v28 }
0x1de2   :  { %3741 = vpow2.f32 %v2938_v31 }
0x1deb   :  { %v3740_v29 = vpop.eup %3739 }
0x1dec   :  { %1893 = vrot.lane.b32.xlu0 %v3740_v29, %s3843_s0  ;;  %v3742_v32 = vpop.eup %3741 }
0x1ded   :  { %v1874_v33 = vadd.f32 1.0, %v3742_v32 }
0x1def   :  { %3743 = vrcp.f32 %v1874_v33  ;;  %v2223_v33 = vld [vmem:[#allocation2 + $0x320] sm:$0xff] }
0x1df9   :  { %v3744_v34 = vpop.eup %3743 }
0x1e5e   :  { %v1894_v13 = vpop.permute.xlu0 %1893 }
0x1e5f   :  { %v4254_v7 = vmul.f32 %v3744_v34, %v1894_v13  ;;  %v2224_v34 = vld [vmem:[#allocation2 + $0x330] sm:$0xff]  ;;  %v2225_v13 = vld [vmem:[#allocation2 + $0x340] sm:$0xff] }
0x1e61   :  { %2939 = vmatmul.mubr.msk.f32.vlgmr.msra.gmra.mrb[10].mxu1 %vm62_vm0, %v4254_v7 }
0x1e62   :  { %3402 = vmatpush1.bf16.msra.mxu1 %v4113_v19  ;;  %2070 = vmatprep.mubr.f32.mxu1 %v3842_v0 }
0x1e63   :  { %3404 = vmatprep.subr.bf16.mxu1 %v4115_v27 }
0x1e66   :  { %3406 = vmatpush1.bf16.msra.mxu1 %v4121_v25 }
0x1e67   :  { %3408 = vmatprep.subr.bf16.mxu1 %v4124_v26 }
0x1e6a   :  { %3410 = vmatpush1.bf16.msra.mxu1 %v4130_v21 }
0x1e6b   :  { %3412 = vmatprep.subr.bf16.mxu1 %v4133_v35 }
0x1e6e   :  { %3414 = vmatpush1.bf16.msra.mxu1 %v4139_v49 }
0x1e6f   :  { %3416 = vmatprep.subr.bf16.mxu1 %v4095_v15 }
0x1f34   :  { %v1966_v30 = vpop.f32.mrb[10].mxu1 }
0x1f35   :  { %v1968_v53 = vpop.f32.mrb[11].mxu1  ;;  %v3519_v47 = vadd.f32 %v1966_v30, %v4177_v40  ;;  %v2226_v30 = vld [vmem:[#allocation2 + $0x350] sm:$0xff] }
0x1f36   :  { %v3520_v36 = vadd.f32 %v1968_v53, %v4171_v38  ;;  %v3435_v53 = vpack.c.bf16 %v2226_v30, %v2225_v13 }
0x1f37   :  { %v2940_v37 = vmul.f32 -1.442695, %v3519_v47  ;;  %v2229_v47 = vld [vmem:[#allocation2 + $0x380] sm:$0xff] }
0x1f38   :  { %3745 = vtanh.f32 %v3520_v36  ;;  %v2941_v3 = vmul.f32 -1.442695, %v3520_v36  ;;  %v2227_v36 = vld [vmem:[#allocation2 + $0x360] sm:$0xff] }
0x1f39   :  { %3747 = vpow2.f32 %v2940_v37  ;;  %v2230_v37 = vld [vmem:[#allocation2 + $0x390] sm:$0xff] }
0x1f42   :  { %v3746_v41 = vpop.eup %3745 }
0x1f43   :  { %1988 = vrot.lane.b32.xlu1 %v3746_v41, %s3843_s0  ;;  %v3748_v48 = vpop.eup %3747  ;;  %v2228_v41 = vld [vmem:[#allocation2 + $0x370] sm:$0xff] }
0x1f44   :  { %v1979_v59 = vadd.f32 1.0, %v3748_v48  ;;  %v3443_v48 = vpack.c.bf16 %v2230_v37, %v2229_v47 }
0x1f46   :  { %3749 = vrcp.f32 %v1979_v59 }
0x1f50   :  { %v3750_v39 = vpop.eup %3749 }
0x1f51   :  { %v1986_v15 = vmul.f32 %v3750_v39, %v1890_v28 }
0x1fb5   :  { %v1989_v43 = vpop.permute.xlu1 %1988 }
0x1fb6   :  { %v1991_v44 = vmul.f32 %v3750_v39, %v1989_v43 }
0x1fb8   :  { %1993 = vrot.lane.b32.xlu0 %v1991_v44, %s3843_s0  ;;  %v2215_v44 = vld [vmem:[#allocation2 + $0x2a0] sm:$0xff] }
0x202a   :  { %v1994_v45 = vpop.permute.xlu0 %1993 }
0x202b   :  { %v1996_v42 = vadd.f32 %v1994_v45, %v1986_v15  ;;  %v2216_v15 = vld [vmem:[#allocation2 + $0x2b0] sm:$0xff] }
0x202c   :  { %v3447_v45 = vpack.c.bf16 %v2216_v15, %v2215_v44 }
0x202d   :  { %3751 = vtanh.f32 %v1996_v42 }
0x202e   :  { %3753 = vpow2.f32 %v2941_v3 }
0x2037   :  { %v3752_v58 = vpop.eup %3751 }
0x2038   :  { %1999 = vrot.lane.b32.xlu1 %v3752_v58, %s3843_s0  ;;  %v3754_v46 = vpop.eup %3753 }
0x2039   :  { %v1980_v50 = vadd.f32 1.0, %v3754_v46 }
0x203b   :  { %3755 = vrcp.f32 %v1980_v50  ;;  %v2217_v50 = vld [vmem:[#allocation2 + $0x2c0] sm:$0xff] }
0x2045   :  { %v3756_v51 = vpop.eup %3755 }
0x20aa   :  { %v2000_v55 = vpop.permute.xlu1 %1999 }
0x20ab   :  { %v4272_v57 = vmul.f32 %v3756_v51, %v2000_v55  ;;  %v2218_v51 = vld [vmem:[#allocation2 + $0x2d0] sm:$0xff] }
0x20ad   :  { %2942 = vmatmul.mubr.msk.f32.vlgmr.msra.gmra.mrb[12].mxu1 %vm62_vm0, %v4272_v57 }
0x20ae   :  { %3418 = vmatpush1.bf16.msra.mxu1 %v4113_v19  ;;  %2176 = vmatprep.mubr.f32.mxu1 %v3842_v0 }
0x20af   :  { %3420 = vmatprep.subr.bf16.mxu1 %v4115_v27 }
0x20b2   :  { %3422 = vmatpush1.bf16.msra.mxu1 %v4121_v25 }
0x20b3   :  { %3424 = vmatprep.subr.bf16.mxu1 %v4124_v26 }
0x20b6   :  { %3426 = vmatpush1.bf16.msra.mxu1 %v4130_v21 }
0x20b7   :  { %3428 = vmatprep.subr.bf16.mxu1 %v4133_v35 }
0x20ba   :  { %3430 = vmatpush1.bf16.msra.mxu1 %v4139_v49 }
0x2180   :  { %v2072_v60 = vpop.f32.mrb[12].mxu1 }
0x2181   :  { %v2074_v62 = vpop.f32.mrb[13].mxu1  ;;  %v3521_v27 = vadd.f32 %v2072_v60, %v4177_v40 }
0x2182   :  { %v3522_v56 = vadd.f32 %v2074_v62, %v4171_v38 }
0x2183   :  { %v2943_v63 = vmul.f32 -1.442695, %v3521_v27  ;;  %v2220_v27 = vld [vmem:[#allocation2 + $0x2f0] sm:$0xff] }
0x2184   :  { %3757 = vtanh.f32 %v3522_v56  ;;  %v2944_v9 = vmul.f32 -1.442695, %v3522_v56  ;;  %v3451_v56 = vpack.c.bf16 %v2218_v51, %v2217_v50  ;;  %v2587_v50 = vld [vmem:[#allocation2 + $0x3c0] sm:$0xff] }
0x2185   :  { %3759 = vpow2.f32 %v2943_v63 }
0x218e   :  { %v3758_v19 = vpop.eup %3757 }
0x218f   :  { %2094 = vrot.lane.b32.xlu0 %v3758_v19, %s3843_s0  ;;  %v3760_v25 = vpop.eup %3759  ;;  %v2219_v19 = vld [vmem:[#allocation2 + $0x2e0] sm:$0xff] }
0x2190   :  { %v2085_v26 = vadd.f32 1.0, %v3760_v25  ;;  %v3455_v63 = vpack.c.bf16 %v2220_v27, %v2219_v19  ;;  %v2221_v25 = vld [vmem:[#allocation2 + $0x300] sm:$0xff]  ;;  %v2598_v27 = vld [vmem:[#allocation2 + $0x470] sm:$0xff] }
0x2191   :  { %v2597_v19 = vld [vmem:[#allocation2 + $0x460] sm:$0xff] }
0x2192   :  { %3761 = vrcp.f32 %v2085_v26  ;;  %v2222_v26 = vld [vmem:[#allocation2 + $0x310] sm:$0xff] }
0x219c   :  { %v3762_v21 = vpop.eup %3761 }
0x219d   :  { %v2092_v49 = vmul.f32 %v3762_v21, %v1996_v42 }
0x2201   :  { %v2095_v1 = vpop.permute.xlu0 %2094 }
0x2202   :  { %v2097_v35 = vmul.f32 %v3762_v21, %v2095_v1  ;;  %v3459_v21 = vpack.c.bf16 %v2222_v26, %v2221_v25  ;;  %v2444_v1 = vld [vmem:[#allocation2 + $0x3a0] ss:$0 sm:$0xff]  ;;  %v3467_v25 = vpack.c.bf16 %v2598_v27, %v2597_v19  ;;  %v2590_v26 = vld [vmem:[#allocation2 + $0x3f0] sm:$0xff] }
0x2204   :  { %2099 = vrot.lane.b32.xlu1 %v2097_v35, %s3843_s0 }
0x2276   :  { %v2100_v2 = vpop.permute.xlu1 %2099 }
0x2277   :  { %v2102_v5 = vadd.f32 %v2100_v2, %v2092_v49 }
0x2279   :  { %3763 = vtanh.f32 %v2102_v5 }
0x227a   :  { %3765 = vpow2.f32 %v2944_v9 }
0x2283   :  { %v3764_v6 = vpop.eup %3763 }
0x2284   :  { %2105 = vrot.lane.b32.xlu0 %v3764_v6, %s3843_s0  ;;  %v3766_v10 = vpop.eup %3765 }
0x2285   :  { %v2086_v61 = vadd.f32 1.0, %v3766_v10 }
0x2287   :  { %3767 = vrcp.f32 %v2086_v61 }
0x2291   :  { %v3768_v11 = vpop.eup %3767 }
0x22f6   :  { %v2106_v12 = vpop.permute.xlu0 %2105 }
0x22f7   :  { %v4289_v14 = vmul.f32 %v3768_v11, %v2106_v12 }
0x22f9   :  { %2945 = vmatmul.mubr.msk.f32.vlgmr.msra.gmra.mrb[14].mxu1 %vm62_vm0, %v4289_v14 }
0x22fa   :  { %3113 = vmatprep.mubr.msk.f32.mxu1 %vm3846_vm1, %v3842_v0 }
0x23cc   :  { %v2178_v16 = vpop.f32.mrb[14].mxu1 }
0x23cd   :  { %v2180_v4 = vpop.f32.mrb[15].mxu1  ;;  %v3523_v22 = vadd.f32 %v2178_v16, %v4177_v40  ;;  %v3439_v40 = vpack.c.bf16 %v2228_v41, %v2227_v36 }
0x23ce   :  { %v3524_v17 = vadd.f32 %v2180_v4, %v4171_v38  ;;  %v3431_v38 = vpack.c.bf16 %v2224_v34, %v2223_v33 }
0x23cf   :  { %v2946_v23 = vmul.f32 -1.442695, %v3523_v22 }
0x23d0   :  { %3769 = vtanh.f32 %v3524_v17  ;;  %3432 = vmatprep.subr.bf16.mxu0 %v3431_v38  ;;  %v2947_v58 = vmul.f32 -1.442695, %v3524_v17  ;;  %v2461_v17 = vld [vmem:[#allocation2 + $0x3b0] ss:$0 sm:$0xff] }
0x23d1   :  { %3771 = vpow2.f32 %v2946_v23  ;;  %3434 = vmatpush3.bf16.msra.mxu0 %v3431_v38 }
0x23d2   :  { %3436 = vmatprep.subr.bf16.mxu0 %v3435_v53 }
0x23d5   :  { %3438 = vmatpush3.bf16.msra.mxu0 %v3435_v53 }
0x23d6   :  { %3440 = vmatprep.subr.bf16.mxu0 %v3439_v40 }
0x23d9   :  { %3442 = vmatpush3.bf16.msra.mxu0 %v3439_v40 }
0x23da   :  { %v3770_v20 = vpop.eup %3769  ;;  %3444 = vmatprep.subr.bf16.mxu0 %v3443_v48 }
0x23db   :  { %2200 = vrot.lane.b32.xlu1 %v3770_v20, %s3843_s0  ;;  %v3772_v24 = vpop.eup %3771 }
0x23dc   :  { %v2191_v28 = vadd.f32 1.0, %v3772_v24 }
0x23dd   :  { %3446 = vmatpush3.bf16.msra.mxu0 %v3443_v48 }
0x23de   :  { %3773 = vrcp.f32 %v2191_v28  ;;  %3448 = vmatprep.subr.bf16.mxu0 %v3447_v45 }
0x23e8   :  { %v3774_v29 = vpop.eup %3773 }
0x23e9   :  { %v2198_v59 = vmul.f32 %v3774_v29, %v2102_v5 }
0x244d   :  { %v2201_v31 = vpop.permute.xlu1 %2200 }
0x244e   :  { %v2203_v32 = vmul.f32 %v3774_v29, %v2201_v31 }
0x2450   :  { %2205 = vrot.lane.b32.xlu0 %v2203_v32, %s3843_s0 }
0x24c2   :  { %v2206_v39 = vpop.permute.xlu0 %2205 }
0x24c3   :  { %v2208_v43 = vadd.f32 %v2206_v39, %v2198_v59 }
0x24c5   :  { %3775 = vtanh.f32 %v2208_v43 }
0x24c6   :  { %3777 = vpow2.f32 %v2947_v58 }
0x24cf   :  { %v3776_v42 = vpop.eup %3775 }
0x24d0   :  { %2211 = vrot.lane.b32.xlu1 %v3776_v42, %s3843_s0  ;;  %v3778_v3 = vpop.eup %3777 }
0x24d1   :  { %v2192_v46 = vadd.f32 1.0, %v3778_v3  ;;  %v2595_v3 = vld [vmem:[#allocation2 + $0x440] sm:$0xff] }
0x24d3   :  { %3779 = vrcp.f32 %v2192_v46  ;;  %v2596_v46 = vld [vmem:[#allocation2 + $0x450] sm:$0xff] }
0x24d4   :  { %v3464_v51 = vpack.c.bf16 %v2596_v46, %v2595_v3 }
0x24dd   :  { %v3780_v55 = vpop.eup %3779 }
0x2542   :  { %v2212_v60 = vpop.permute.xlu1 %2211 }
0x2543   :  { %v4298_v62 = vmul.f32 %v3780_v55, %v2212_v60  ;;  %v2588_v55 = vld [vmem:[#allocation2 + $0x3d0] sm:$0xff]  ;;  %v3845_v60 = vmov 0.0|0.0  }
0x2544   :  { %3475 = vmatprep.subr.bf16.mxu1 %v3845_v60 }
0x2545   :  { %3038 = vmatprep.mubr.msk.f32.mxu0 %vm62_vm0, %v4298_v62 }
0x2546   :  { %3039 = vmatmul.mubr.msk.f32.vlgmr.msra.gmra.mrb[16].mxu0 %vm62_vm0, %v4289_v14 }
0x2547   :  { %3041 = vmatprep.mubr.msk.f32.mxu0 %vm62_vm0, %v4272_v57  ;;  %3450 = vmatpush3.bf16.msra.mxu0 %v3447_v45 }
0x2548   :  { %3452 = vmatprep.subr.bf16.mxu0 %v3451_v56 }
0x254a   :  { %3042 = vmatmul.mubr.msk.f32.gmra.mrb[18].mxu0 %vm62_vm0, %v4254_v7 }
0x254b   :  { %3044 = vmatprep.mubr.msk.f32.mxu0 %vm62_vm0, %v4236_v8  ;;  %3454 = vmatpush3.bf16.msra.mxu0 %v3451_v56  ;;  %v3476_v56 = vpack.c.bf16 %v2588_v55, %v2587_v50 }
0x254c   :  { %3456 = vmatprep.subr.bf16.mxu0 %v3455_v63 }
0x254d   :  { %3477 = vmatpush3.bf16.msra.mxu1 %v3476_v56 }
0x254e   :  { %3045 = vmatmul.mubr.msk.f32.gmra.mrb[20].mxu0 %vm62_vm0, %v4218_v52  ;;  %3478 = vmatprep.subr.bf16.mxu1 %v3845_v60 }
0x254f   :  { %3047 = vmatprep.mubr.msk.f32.mxu0 %vm62_vm0, %v4200_v18  ;;  %3458 = vmatpush3.bf16.msra.mxu0 %v3455_v63  ;;  %v2589_v63 = vld [vmem:[#allocation2 + $0x3e0] sm:$0xff] }
0x2550   :  { %3460 = vmatprep.subr.bf16.mxu0 %v3459_v21 }
0x2552   :  { %3048 = vmatmul.mubr.msk.f32.gmra.mrb[22].mxu0 %vm62_vm0, %v4182_v54 }
0x2553   :  { %3462 = vmatpush3.bf16.msra.mxu0 %v3459_v21  ;;  %3066 = vmatprep.mubr.msk.f32.mxu0 %vm62_vm0, %v4182_v54  ;;  %v2599_v21 = vld [vmem:[#allocation2 + $0x480] sm:$0xff] }
0x2554   :  { %3463 = vmatprep.subr.bf16.mxu0 %v3845_v60 }
0x2556   :  { %3067 = vmatmul.mubr.msk.f32.vlgmr.msra.gmra.mrb[16].mxu0 %vm62_vm0, %v4200_v18 }
0x2557   :  { %3069 = vmatprep.mubr.msk.f32.mxu0 %vm62_vm0, %v4218_v52  ;;  %3465 = vmatpush3.bf16.msra.mxu0 %v3464_v51 }
0x2558   :  { %3466 = vmatprep.subr.bf16.mxu0 %v3845_v60 }
0x255a   :  { %3070 = vmatmul.mubr.msk.f32.gmra.mrb[18].mxu0 %vm62_vm0, %v4236_v8 }
0x255b   :  { %3072 = vmatprep.mubr.msk.f32.mxu0 %vm62_vm0, %v4254_v7  ;;  %3468 = vmatpush3.bf16.msra.mxu0 %v3467_v25 }
0x255c   :  { %3469 = vmatprep.subr.bf16.mxu0 %v3845_v60 }
0x255e   :  { %3073 = vmatmul.mubr.msk.f32.gmra.mrb[20].mxu0 %vm62_vm0, %v4272_v57 }
0x255f   :  { %3075 = vmatprep.mubr.msk.f32.mxu0 %vm62_vm0, %v4289_v14 }
0x2562   :  { %3076 = vmatmul.mubr.msk.f32.gmra.mrb[22].mxu0 %vm62_vm0, %v4298_v62 }
0x2563   :  { %3094 = vmatprep.mubr.msk.f32.mxu0 %vm3846_vm1, %v3842_v0 }
0x2629   :  { %v3068_v35 = vpop.f32.mrb[16].mxu0 }
0x262a   :  { %v2446_v49 = vadd.f32 %v3068_v35, %v2444_v1  ;;  %v2405_v2 = vpop.f32.mrb[17].mxu0  ;;  %v3479_v35 = vpack.c.bf16 %v2590_v26, %v2589_v63 }
0x262b   :  { %v2445_v5 = vadd.f32 %v2444_v1, %v2405_v2  ;;  %v2592_v2 = vld [vmem:[#allocation2 + $0x410] sm:$0xff] }
0x262c   :  { %3781 = vtanh.f32 %v2446_v49  ;;  %v2591_v49 = vld [vmem:[#allocation2 + $0x400] sm:$0xff]  ;;  %3480 = vmatpush3.bf16.msra.mxu1 %v3479_v35 }
0x262d   :  { %3783 = vtanh.f32 %v2445_v5  ;;  %v3071_v6 = vpop.f32.mrb[18].mxu0  ;;  %3481 = vmatprep.subr.bf16.mxu1 %v3845_v60 }
0x262e   :  { %v2448_v9 = vadd.f32 %v3071_v6, %v2444_v1  ;;  %v2415_v10 = vpop.f32.mrb[19].mxu0  ;;  %v3482_v6 = vpack.c.bf16 %v2592_v2, %v2591_v49 }
0x262f   :  { %v2447_v61 = vadd.f32 %v2444_v1, %v2415_v10  ;;  %v2602_v10 = vld [vmem:[#allocation2 + $0x4b0] sm:$0xff] }
0x2630   :  { %3785 = vtanh.f32 %v2448_v9  ;;  %v2601_v9 = vld [vmem:[#allocation2 + $0x4a0] sm:$0xff]  ;;  %3483 = vmatpush3.bf16.msra.mxu1 %v3482_v6 }
0x2631   :  { %3787 = vtanh.f32 %v2447_v61  ;;  %v3074_v11 = vpop.f32.mrb[20].mxu0  ;;  %v2593_v61 = vld [vmem:[#allocation2 + $0x420] sm:$0xff]  ;;  %3484 = vmatprep.subr.bf16.mxu1 %v3845_v60 }
0x2632   :  { %v2450_v12 = vadd.f32 %v3074_v11, %v2444_v1  ;;  %v2425_v16 = vpop.f32.mrb[21].mxu0  ;;  %v2594_v11 = vld [vmem:[#allocation2 + $0x430] sm:$0xff] }
0x2633   :  { %v2449_v4 = vadd.f32 %v2444_v1, %v2425_v16  ;;  %v3485_v16 = vpack.c.bf16 %v2594_v11, %v2593_v61 }
0x2634   :  { %3789 = vtanh.f32 %v2450_v12  ;;  %v3473_v12 = vpack.c.bf16 %v2602_v10, %v2601_v9 }
0x2635   :  { %3791 = vtanh.f32 %v2449_v4  ;;  %v3077_v20 = vpop.f32.mrb[22].mxu0  ;;  %3486 = vmatpush3.bf16.msra.mxu1 %v3485_v16 }
0x2636   :  { %v3782_v22 = vpop.eup %3781  ;;  %v2452_v23 = vadd.f32 %v3077_v20, %v2444_v1  ;;  %v2435_v24 = vpop.f32.mrb[23].mxu0 }
0x2637   :  { %v3784_v28 = vpop.eup %3783  ;;  %v2451_v29 = vadd.f32 %v2444_v1, %v2435_v24  ;;  %v2463_v31 = vmul.f32 %v3782_v22, %v2461_v17  ;;  %v2600_v1 = vld [vmem:[#allocation2 + $0x490] sm:$0xff] }
0x2638   :  { %3793 = vtanh.f32 %v2452_v23  ;;  %v2462_v32 = vmul.f32 %v3784_v28, %v2461_v17  ;;  %v3470_v5 = vpack.c.bf16 %v2600_v1, %v2599_v21 }
0x2639   :  { %3795 = vtanh.f32 %v2451_v29  ;;  %v2473_v33 = vsel %vm62_vm0, %v2463_v31, 0.0 }
0x263a   :  { %v3786_v34 = vpop.eup %3785  ;;  %2474 = vadd.xlane.f32.xlu1 %v2473_v33  ;;  %v2470_v13 = vsel %vm62_vm0, %v2462_v32, 0.0  ;;  %3471 = vmatpush3.bf16.msra.mxu0 %v3470_v5 }
0x263b   :  { %v3788_v38 = vpop.eup %3787  ;;  %2471 = vadd.xlane.f32.xlu0 %v2470_v13  ;;  %v2465_v30 = vmul.f32 %v3786_v34, %v2461_v17  ;;  %3472 = vmatprep.subr.bf16.mxu0 %v3845_v60 }
0x263c   :  { %v2464_v41 = vmul.f32 %v3788_v38, %v2461_v17 }
0x263d   :  { %v2479_v53 = vsel %vm62_vm0, %v2465_v30, 0.0 }
0x263e   :  { %v3790_v36 = vpop.eup %3789  ;;  %v2476_v48 = vsel %vm62_vm0, %v2464_v41, 0.0  ;;  %3474 = vmatpush3.bf16.msra.mxu0 %v3473_v12 }
0x263f   :  { %v3792_v40 = vpop.eup %3791  ;;  %2480 = vadd.xlane.f32.xlu0 %v2479_v53  ;;  %v2467_v39 = vmul.f32 %v3790_v36, %v2461_v17  ;;  %3487 = vmatprep.subr.bf16.mxu0 %v3845_v60 }
0x2640   :  { %v2466_v47 = vmul.f32 %v3792_v40, %v2461_v17 }
0x2641   :  { %v2485_v15 = vsel %vm62_vm0, %v2467_v39, 0.0 }
0x2642   :  { %v3794_v37 = vpop.eup %3793  ;;  %v2482_v59 = vsel %vm62_vm0, %v2466_v47, 0.0 }
0x2643   :  { %v3796_v43 = vpop.eup %3795  ;;  %2477 = vadd.xlane.f32.xlu0 %v2476_v48  ;;  %2483 = vadd.xlane.f32.xlu1 %v2482_v59  ;;  %v2469_v42 = vmul.f32 %v3794_v37, %v2461_v17 }
0x2644   :  { %v2468_v44 = vmul.f32 %v3796_v43, %v2461_v17 }
0x2645   :  { %v2491_v58 = vsel %vm62_vm0, %v2469_v42, 0.0 }
0x2646   :  { %v2488_v45 = vsel %vm62_vm0, %v2468_v44, 0.0 }
0x2647   :  { %2486 = vadd.xlane.f32.xlu0 %v2485_v15  ;;  %2489 = vadd.xlane.f32.xlu1 %v2488_v45 }
0x264b   :  { %2492 = vadd.xlane.f32.xlu0 %v2491_v58 }
0x2661   :  { %2834 = vrot.lane.b32.xlu0 %v3842_v0, %s3844_s10 }
0x26c7   :  { %v2475_v17 = vpop.xlane.xlu1 %2474 }
0x26c8   :  { %v2472_v4 = vpop.xlane.xlu0 %2471 }
0x26cc   :  { %v2481_v20 = vpop.xlane.xlu0 %2480 }
0x26d0   :  { %v2478_v22 = vpop.xlane.xlu0 %2477  ;;  %v2484_v23 = vpop.xlane.xlu1 %2483 }
0x26d1   :  { %v2494_v32 = vmax.f32 %v2472_v4, %v2484_v23 }
0x26d4   :  { %v2487_v24 = vpop.xlane.xlu0 %2486  ;;  %v2490_v28 = vpop.xlane.xlu1 %2489 }
0x26d5   :  { %v2495_v29 = vmax.f32 %v2475_v17, %v2487_v24  ;;  %v2496_v33 = vmax.f32 %v2478_v22, %v2490_v28 }
0x26d7   :  { %v2498_v13 = vmax.f32 %v2494_v32, %v2495_v29 }
0x26d8   :  { %v2493_v31 = vpop.xlane.xlu0 %2492 }
0x26d9   :  { %v2497_v34 = vmax.f32 %v2481_v20, %v2493_v31 }
0x26db   :  { %v2499_v38 = vmax.f32 %v2496_v33, %v2497_v34 }
0x26dc   :  { %v2835_v29 = vpop.permute.xlu0 %2834 }
0x26dd   :  { %v2500_v30 = vmax.f32 %v2498_v13, %v2499_v38 }
0x26df   :  { %v2501_v53 = vsub.f32 %v2472_v4, %v2500_v30  ;;  %v2502_v36 = vsub.f32 %v2475_v17, %v2500_v30  ;;  %v2503_v41 = vsub.f32 %v2478_v22, %v2500_v30  ;;  %v2504_v40 = vsub.f32 %v2481_v20, %v2500_v30 }
0x26e0   :  { %v2505_v48 = vsub.f32 %v2484_v23, %v2500_v30  ;;  %v2506_v39 = vsub.f32 %v2487_v24, %v2500_v30  ;;  %v2507_v44 = vsub.f32 %v2490_v28, %v2500_v30  ;;  %v2508_v45 = vsub.f32 %v2493_v31, %v2500_v30 }
0x26e1   :  { %v2509_v47 = vmul.f32 1.442695, %v2501_v53  ;;  %v2511_v37 = vmul.f32 1.442695, %v2502_v36  ;;  %v2513_v59 = vmul.f32 1.442695, %v2503_v41 }
0x26e2   :  { %v2515_v43 = vmul.f32 1.442695, %v2504_v40  ;;  %v2517_v15 = vmul.f32 1.442695, %v2505_v48  ;;  %v2519_v42 = vmul.f32 1.442695, %v2506_v39 }
0x26e3   :  { %3797 = vpow2.f32 %v2509_v47  ;;  %v2521_v58 = vmul.f32 1.442695, %v2507_v44  ;;  %v2523_v3 = vmul.f32 1.442695, %v2508_v45 }
0x26e4   :  { %3799 = vpow2.f32 %v2511_v37 }
0x26e5   :  { %3801 = vpow2.f32 %v2513_v59 }
0x26e6   :  { %3803 = vpow2.f32 %v2515_v43 }
0x26e7   :  { %3805 = vpow2.f32 %v2517_v15 }
0x26e8   :  { %3807 = vpow2.f32 %v2519_v42 }
0x26e9   :  { %3809 = vpow2.f32 %v2521_v58 }
0x26ea   :  { %3811 = vpow2.f32 %v2523_v3 }
0x26ed   :  { %v3798_v46 = vpop.eup %3797 }
0x26ee   :  { %v3800_v50 = vpop.eup %3799 }
0x26ef   :  { %v2525_v51 = vadd.f32 %v3800_v50, %v3798_v46  ;;  %v3802_v55 = vpop.eup %3801 }
0x26f0   :  { %v3804_v19 = vpop.eup %3803 }
0x26f1   :  { %v2526_v56 = vadd.f32 %v3802_v55, %v2525_v51  ;;  %v3806_v63 = vpop.eup %3805 }
0x26f2   :  { %v3808_v26 = vpop.eup %3807 }
0x26f3   :  { %v2527_v27 = vadd.f32 %v3804_v19, %v2526_v56  ;;  %v3810_v1 = vpop.eup %3809 }
0x26f4   :  { %v3812_v49 = vpop.eup %3811 }
0x26f5   :  { %v2528_v25 = vadd.f32 %v3806_v63, %v2527_v27 }
0x26f7   :  { %v2529_v21 = vadd.f32 %v3808_v26, %v2528_v25 }
0x26f9   :  { %v2530_v35 = vadd.f32 %v3810_v1, %v2529_v21 }
0x26fb   :  { %v2531_v2 = vadd.f32 %v3812_v49, %v2530_v35 }
0x26fd   :  { %3813 = vrcp.f32 %v2531_v2 }
0x2707   :  { %v3814_v5 = vpop.eup %3813 }
0x2708   :  { %v4355_v6 = vmul.f32 %v3814_v5, %v3798_v46  ;;  %v2534_v9 = vmul.f32 %v3814_v5, %v3800_v50  ;;  %v2535_v10 = vmul.f32 %v3814_v5, %v3802_v55  ;;  %v2536_v61 = vmul.f32 %v3814_v5, %v3804_v19 }
0x2709   :  { %v2537_v11 = vmul.f32 %v3814_v5, %v3806_v63  ;;  %v4357_v12 = vmul.f32 %v3814_v5, %v3808_v26  ;;  %v4359_v16 = vmul.f32 %v3814_v5, %v3812_v49  ;;  %v4361_v4 = vmul.f32 %v3814_v5, %v3810_v1 }
0x270a   :  { %v2542_v17 = vmul.f32 %v2534_v9, %v4200_v18  ;;  %v2564_v20 = vmul.f32 %v4355_v6, %v4298_v62  ;;  %v2565_v22 = vmul.f32 %v2534_v9, %v4289_v14  ;;  %v2566_v23 = vmul.f32 %v2535_v10, %v4272_v57 }
0x270b   :  { %v2567_v24 = vmul.f32 %v2536_v61, %v4254_v7  ;;  %v2568_v28 = vmul.f32 %v2537_v11, %v4236_v8  ;;  %v2569_v31 = vmul.f32 %v4357_v12, %v4218_v52  ;;  %v2840_v33 = vsel %vm2838_vm2, %v2534_v9, 0.0 }
0x270c   :  { %v2572_v32 = vsel %vm62_vm0, %v2564_v20, 0.0  ;;  %v2841_v34 = vsel %vm2838_vm2, %v2535_v10, 0.0  ;;  %v2573_v13 = vsel %vm62_vm0, %v2565_v22, 0.0  ;;  %v2575_v38 = vsel %vm62_vm0, %v2566_v23, 0.0 }
0x270d   :  { %v2577_v30 = vsel %vm62_vm0, %v2567_v24, 0.0  ;;  %v2842_v53 = vsel %vm2838_vm2, %v2536_v61, 0.0  ;;  %v2574_v36 = vadd.f32 %v2573_v13, %v2572_v32  ;;  %v2843_v41 = vsel %vm2838_vm2, %v2537_v11, 0.0 }
0x270e   :  { %v2844_v40 = vsel %vm2838_vm2, %v4357_v12, 0.0  ;;  %v2845_v47 = vsel %vm2838_vm2, %v4361_v4, 0.0  ;;  %v2846_v37 = vsel %vm2838_vm2, %v4359_v16, 0.0  ;;  %v2849_v48 = vsel %vm2847_vm3, %v2840_v33, %v2835_v29 }
0x270f   :  { %v2850_v59 = vsel %vm2847_vm3, %v2841_v34, %v2835_v29  ;;  %v2851_v39 = vsel %vm2847_vm3, %v2842_v53, %v2835_v29  ;;  %v2576_v43 = vadd.f32 %v2575_v38, %v2574_v36  ;;  %v2852_v44 = vsel %vm2847_vm3, %v2843_v41, %v2835_v29  ;;  %v2753_v34 = vld [vmem:[#allocation2 + $0x4e0] sm:$0xff] }
0x2710   :  { %v2853_v15 = vsel %vm2847_vm3, %v2844_v40, %v2835_v29  ;;  %v2854_v45 = vsel %vm2847_vm3, %v2845_v47, %v2835_v29  ;;  %v2855_v42 = vsel %vm2847_vm3, %v2846_v37, %v2835_v29  ;;  %v2858_v58 = vsel %vm2856_vm4, %v2849_v48, 0.0  ;;  %v2749_v36 = vld [vmem:[#allocation2 + $0x4c0] ss:$0 sm:$0xff]  ;;  %v2756_v48 = vld [vmem:[#allocation2 + $0x510] ss:$0 sm:$0xff] }
0x2711   :  { %v2859_v3 = vsel %vm2856_vm4, %v2850_v59, 0.0  ;;  %v2860_v46 = vsel %vm2856_vm4, %v2851_v39, 0.0  ;;  %v2861_v50 = vsel %vm2856_vm4, %v2852_v44, 0.0  ;;  %v2862_v51 = vsel %vm2856_vm4, %v2853_v15, 0.0  ;;  %2866 = vst [vmem:[%s4463_s2 + $0x8] sm:$0xff] %v2858_v58 }
0x2712   :  { %v2863_v55 = vsel %vm2856_vm4, %v2854_v45, 0.0  ;;  %v2864_v56 = vsel %vm2856_vm4, %v2855_v42, 0.0  ;;  %2867 = vst [vmem:[%s4463_s2 + $0x10] sm:$0xff] %v2859_v3  ;;  %2868 = vst [vmem:[%s4463_s2 + $0x18] sm:$0xff] %v2860_v46  ;;  %v2578_v19 = vadd.f32 %v2577_v30, %v2576_v43  ;;  %v2543_v27 = vmul.f32 %v2535_v10, %v4218_v52 }
0x2713   :  { %2869 = vst [vmem:[%s4463_s2 + $0x20] sm:$0xff] %v2861_v50  ;;  %2870 = vst [vmem:[%s4463_s2 + $0x28] sm:$0xff] %v2862_v51  ;;  %v2570_v63 = vmul.f32 %v4361_v4, %v4200_v18  ;;  %v2579_v25 = vsel %vm62_vm0, %v2568_v28, 0.0  ;;  %v2541_v26 = vmul.f32 %v4355_v6, %v4182_v54  ;;  %v2571_v21 = vmul.f32 %v4359_v16, %v4182_v54 }
0x2714   :  { %2871 = vst [vmem:[%s4463_s2 + $0x30] sm:$0xff] %v2863_v55  ;;  %2872 = vst [vmem:[%s4463_s2 + $0x38] sm:$0xff] %v2864_v56  ;;  %v2580_v1 = vadd.f32 %v2579_v25, %v2578_v19  ;;  %v2581_v35 = vsel %vm62_vm0, %v2569_v31, 0.0  ;;  %v2544_v49 = vmul.f32 %v2536_v61, %v4236_v8  ;;  %v2550_v52 = vsel %vm62_vm0, %v2542_v17, 0.0 }
0x2715   :  { %v2549_v2 = vsel %vm62_vm0, %v2541_v26, 0.0  ;;  %v2583_v18 = vsel %vm62_vm0, %v2570_v63, 0.0  ;;  %v2545_v10 = vmul.f32 %v2537_v11, %v4254_v7  ;;  %v2552_v20 = vsel %vm62_vm0, %v2543_v27, 0.0 }
0x2716   :  { %v2582_v5 = vadd.f32 %v2581_v35, %v2580_v1  ;;  %v2551_v9 = vadd.f32 %v2550_v52, %v2549_v2  ;;  %v2839_v54 = vsel %vm2838_vm2, %v4355_v6, 0.0  ;;  %v2585_v24 = vsel %vm62_vm0, %v2571_v21, 0.0 }
0x2717   :  { %v2546_v8 = vmul.f32 %v4357_v12, %v4272_v57  ;;  %v2554_v61 = vsel %vm62_vm0, %v2544_v49, 0.0  ;;  %v2547_v29 = vmul.f32 %v4361_v4, %v4289_v14  ;;  %v2556_v7 = vsel %vm62_vm0, %v2545_v10, 0.0  ;;  %v2752_v4 = vld [vmem:[#allocation2 + $0x4d0] sm:$0xff] }
0x2718   :  { %v2584_v22 = vadd.f32 %v2583_v18, %v2582_v5  ;;  %v2553_v23 = vadd.f32 %v2552_v20, %v2551_v9  ;;  %v2548_v6 = vmul.f32 %v4359_v16, %v4298_v62  ;;  %v3488_v13 = vpack.c.bf16 %v2753_v34, %v2752_v4  ;;  %v2754_v62 = vld [vmem:[#allocation2 + $0x4f0] sm:$0xff]  ;;  %v2755_v16 = vld [vmem:[#allocation2 + $0x500] sm:$0xff] }
0x2719   :  { %v2558_v31 = vsel %vm62_vm0, %v2546_v8, 0.0  ;;  %v2560_v12 = vsel %vm62_vm0, %v2547_v29, 0.0  ;;  %v3491_v38 = vpack.c.bf16 %v2755_v16, %v2754_v62 }
0x271a   :  { %v2586_v17 = vadd.f32 %v2585_v24, %v2584_v22  ;;  %v2555_v28 = vadd.f32 %v2554_v61, %v2553_v23  ;;  %v2562_v33 = vsel %vm62_vm0, %v2548_v6, 0.0 }
0x271c   :  { %3095 = vmatmul.mubr.msk.f32.vlgmr.msra.gmra.mrb[24].mxu0 %vm62_vm0, %v2586_v17  ;;  %v2557_v11 = vadd.f32 %v2556_v7, %v2555_v28 }
0x271d   :  { %3124 = vmatprep.mubr.msk.f32.mxu0 %vm3846_vm1, %v3842_v0  ;;  %3489 = vmatpush3.bf16.msra.mxu0 %v3488_v13 }
0x271e   :  { %v2559_v57 = vadd.f32 %v2558_v31, %v2557_v11  ;;  %3490 = vmatprep.subr.bf16.mxu0 %v3845_v60 }
0x2720   :  { %v2561_v32 = vadd.f32 %v2560_v12, %v2559_v57 }
0x2721   :  { %3492 = vmatpush3.bf16.msra.mxu0 %v3491_v38 }
0x2722   :  { %v2563_v14 = vadd.f32 %v2562_v33, %v2561_v32 }
0x2724   :  { %3114 = vmatmul.mubr.msk.f32.vlgmr.msra.gmra.mrb[16].mxu1 %vm62_vm0, %v2563_v14 }
0x27ef   :  { %v2672_v0 = vpop.f32.mrb[24].mxu0 }
0x27f0   :  { %v3096_v30 = vpop.f32.mrb[25].mxu0 }
0x27f7   :  { %v2745_v53 = vpop.f32.mrb[16].mxu1 }
0x27f8   :  { %v2746_v41 = vadd.f32 %v2745_v53, %v2672_v0  ;;  %v3115_v40 = vpop.f32.mrb[17].mxu1 }
0x27fa   :  { %v2750_v47 = vadd.f32 %v2749_v36, %v2746_v41 }
0x27fc   :  { %v2751_v37 = vmax.f32 %v2750_v47, 0.0 }
0x27fe   :  { %3125 = vmatmul.mubr.msk.f32.vlgmr.msra.gmra.mrb[26].mxu0 %vm2757_vm5, %v2751_v37 }
0x28d1   :  { %v2827_v59 = vpop.f32.mrb[26].mxu0 }
0x28d2   :  { %v2828_v39 = vadd.f32 %v2827_v59, %v2756_v48  ;;  %v3126_v43 = vpop.f32.mrb[27].mxu0 }
0x28d4   :  { %2832 = vrot.lane.b32.xlu1 %v2828_v39, %s3844_s10 }
0x2946   :  { %v2833_v60 = vpop.permute.xlu1 %2832 }
0x2947   :  { %v2848_v44 = vsel %vm2847_vm3, %v2839_v54, %v2833_v60 }
0x2948   :  { %v2857_v15 = vsel %vm2856_vm4, %v2848_v44, 0.0 }
0x2949   :  { %2865 = vst [vmem:[%s4463_s2] sm:$0xff] %v2857_v15 }
0x294a   :  { %2877 = vsyncpa [#allocation3], 1 }

</bundles_post_ra>
